<compile_context>
chip_gen: v7x
topology: tpu7x:2x2x1
jax: 0.10.0
libtpu: 0.0.40
codegen_flags: <defaults>
</compile_context>

<pallas_src>
from functools import partial

import jax
import jax.numpy as jnp
from jax.experimental import pallas as pl
from jax.experimental.pallas import tpu as pltpu


# -----------------------------------------------------------------------------
# Fused conv (KH block-Toeplitz matmuls) + BN-stat accumulation + BN/ReLU
# finalize on the last grid step.
# -----------------------------------------------------------------------------
def _fused_conv_bn_relu_kernel(x_ref, w_ref, fold_ref, gamma_ref, beta_ref,
                               out_ref, conv_buf, sum_buf, ssq_buf,
                               *, TH, KH, inv_count, eps):
    """Grid = (N, R): one padded image along axis 0, TH output rows along axis 1.

      x_ref:     (1, Hp, Kp)       padded image, (W, Cin) folded into lanes.
      w_ref:     (KH, Kp, Ndim)    block-Toeplitz conv weight (resident).
      fold_ref:  (Ndim, Ndim)      0/1 channel-fold matrix (resident).
      gamma_ref: (1, Ndim)         BN gamma broadcast to folded lanes.
      beta_ref:  (1, Ndim)         BN beta broadcast to folded lanes.
      out_ref:   (N, Ho, Ndim)     full output (resident), written on last step.
      conv_buf:  (N, Ho, Ndim) f32 VMEM-resident conv activations.
      sum_buf / ssq_buf: (1, Ndim) f32 running per-lane statistics.
    """
    n = pl.program_id(0)
    r = pl.program_id(1)
    is_first = jnp.logical_and(n == 0, r == 0)
    is_last = jnp.logical_and(n == pl.num_programs(0) - 1,
                              r == pl.num_programs(1) - 1)

    @pl.when(is_first)
    def _init():
        sum_buf[...] = jnp.zeros_like(sum_buf)
        ssq_buf[...] = jnp.zeros_like(ssq_buf)

    # KH "fat" matmuls against the per-kh Toeplitz blocks; register accumulation
    # (first tap assigns, later taps add) -> exactly one VMEM store of the tile.
    row0 = pl.multiple_of(r * TH, TH)
    acc = jnp.dot(x_ref[0, pl.ds(row0, TH), :], w_ref[0],
                  preferred_element_type=jnp.float32)
    for kh in range(1, KH):
        acc = acc + jnp.dot(x_ref[0, pl.ds(row0 + kh, TH), :], w_ref[kh],
                            preferred_element_type=jnp.float32)

    conv_buf[n, pl.ds(row0, TH), :] = acc

    # Single-pass per-lane statistics (finalized below).
    # TODO(synk): switch to mean-then-centered-variance if E[x^2]-E[x]^2
    # cancellation matters for the target data distribution.
    sum_buf[...] += jnp.sum(acc, axis=0, keepdims=True)
    ssq_buf[...] += jnp.sum(acc * acc, axis=0, keepdims=True)

    @pl.when(is_last)
    def _finalize():
        # Per-channel reduction over Wo + broadcast back to every folded lane,
        # all in one MXU matmul with the 0/1 fold matrix (no lane reshuffles).
        csum = jnp.dot(sum_buf[...], fold_ref[...],
                       preferred_element_type=jnp.float32)        # (1, Ndim)
        cssq = jnp.dot(ssq_buf[...], fold_ref[...],
                       preferred_element_type=jnp.float32)        # (1, Ndim)
        mean = csum * inv_count
        var = jnp.maximum(cssq * inv_count - mean * mean, 0.0)    # biased (train BN)
        scale = gamma_ref[...] * jax.lax.rsqrt(var + eps)
        shift = beta_ref[...] - mean * scale

        # Fused BN + ReLU over one flattened lane-dense slab.
        ndim = scale.shape[-1]
        conv = conv_buf[...].reshape(-1, ndim)                    # (N*Ho, Ndim)
        y = jnp.maximum(conv * scale + shift, 0.0)
        out_ref[...] = y.reshape(out_ref.shape).astype(out_ref.dtype)


# -----------------------------------------------------------------------------
# Wrapper: PyTorch NCHW / OIHW in, NCHW out.
# -----------------------------------------------------------------------------
def basic_conv2d(x_nchw, w_oihw, gamma, beta, *, padding=1, eps=1e-5,
                 row_block=512, matmul_dtype=jnp.bfloat16):
    """stride=1, dilation=1, groups=1, bias=False (MINet BasicConv2d defaults).
    matmul_dtype: dtype of the MXU operands (accumulation / BN math stay f32);
    pass None to keep float32 operands.
    # TODO(synk): stride>1 / dilation / groups are not implemented."""
    N, Cin, H, W = x_nchw.shape
    Cout, Cin_w, KH, KW = w_oihw.shape
    assert Cin_w == Cin, "groups != 1 not supported"

    # ---- wrapper-side layout glue (NCHW in / NCHW out) ----
    # TODO(synk): if the surrounding graph can consume NHWC / folded layouts,
    # drop these transposes (each is a full HBM pass outside the kernel).
    x = jnp.transpose(x_nchw, (0, 2, 3, 1))                        # NHWC
    x = jnp.pad(x, ((0, 0), (padding, padding), (padding, padding), (0, 0)))
    _, Hp, Wp, _ = x.shape
    Ho, Wo = Hp - KH + 1, Wp - KW + 1                              # stride = 1
    Kdim, Ndim = Wp * Cin, Wo * Cout
    Kp = ((Kdim + 127) // 128) * 128          # pad folded K to full 128-lane vregs
    xf = x.reshape(N, Hp, Kdim)
    if Kp != Kdim:
        xf = jnp.pad(xf, ((0, 0), (0, 0), (0, Kp - Kdim)))

    # Block-Toeplitz weight: T[kh, p*Cin+ci, o*Cout+co] = w[co, ci, kh, p-o].
    # TODO(synk): band-tile the Toeplitz (per-Wo column blocks) for large W so
    # the (W*Cin)x(W*Cout) dense weight does not blow v7x's 64 MiB VMEM.
    w = jnp.transpose(w_oihw, (2, 3, 1, 0)).astype(jnp.float32)    # (KH,KW,Cin,Cout)
    shift_eye = (jnp.arange(Wp)[None, :, None]
                 == jnp.arange(Wo)[None, None, :] + jnp.arange(KW)[:, None, None])
    T = jnp.einsum('kpo,hkic->hpioc', shift_eye.astype(jnp.float32), w)
    T = T.reshape(KH, Kdim, Ndim)
    if Kp != Kdim:
        T = jnp.pad(T, ((0, 0), (0, Kp - Kdim), (0, 0)))

    if matmul_dtype is not None:
        xf = xf.astype(matmul_dtype)
        T = T.astype(matmul_dtype)

    # 0/1 channel-fold matrix: lane j of (stats @ fold) = total of channel j%Cout.
    lane_ch = jnp.arange(Ndim) % Cout
    fold = (lane_ch[:, None] == lane_ch[None, :]).astype(jnp.float32)

    gamma_f = jnp.tile(gamma.astype(jnp.float32), Wo).reshape(1, Ndim)
    beta_f = jnp.tile(beta.astype(jnp.float32), Wo).reshape(1, Ndim)

    # ---- tiling: biggest row tile that divides Ho (keeps the matmul M large) ----
    TH = Ho if Ho <= row_block else max(d for d in range(1, row_block + 1)
                                        if Ho % d == 0)
    R = Ho // TH
    inv_count = 1.0 / float(N * Ho * Wo)

    # ---- generation-aware VMEM budget ----
    def _nbytes(shape, dtype):
        size = 1
        for d in shape:
            size *= int(d)
        return size * jnp.dtype(dtype).itemsize

    try:
        vmem_cap = int(pltpu.get_tpu_info().vmem_capacity_bytes)
    except Exception:
        vmem_cap = 64 << 20                    # conservative (v7x per-core VMEM)
    vmem_budget = (3 * vmem_cap) // 4

    resident_bytes = (2 * _nbytes((1, Hp, Kp), xf.dtype)           # double-buffered x
                      + 2 * _nbytes((KH, Kp, Ndim), T.dtype)       # weight (<=2 bufs)
                      + 2 * _nbytes((Ndim, Ndim), jnp.float32)     # fold matrix
                      + _nbytes((N, Ho, Ndim), jnp.float32)        # conv scratch
                      + _nbytes((N, Ho, Ndim), x_nchw.dtype)       # resident output
                      + 8 * _nbytes((1, Ndim), jnp.float32))       # stats / params
    if resident_bytes > vmem_budget:
        # TODO(synk): fall back to a two-pass (conv+stats then BN+ReLU) variant
        # that spills conv activations to HBM when they do not fit on-chip.
        raise NotImplementedError("activation/weight footprint exceeds VMEM budget")
    vmem_limit = int(min(max(resident_bytes + (2 << 20), 4 << 20), vmem_budget))

    flops = 2 * N * Ho * KH * Kp * Ndim
    bytes_accessed = (xf.size * xf.dtype.itemsize + T.size * T.dtype.itemsize
                      + fold.size * 4
                      + N * Ho * Ndim * jnp.dtype(x_nchw.dtype).itemsize)

    kernel = partial(_fused_conv_bn_relu_kernel, TH=TH, KH=KH,
                     inv_count=inv_count, eps=float(eps))

    def _build(single_buffer_consts):
        def const_spec(shape):
            idx = lambda n, r: (0,) * len(shape)
            if single_buffer_consts:
                # Never-changing operands: one buffer instead of two.
                return pl.BlockSpec(shape, idx, pipeline_mode=pl.Buffered(1))
            return pl.BlockSpec(shape, idx)

        grid_spec = pltpu.PrefetchScalarGridSpec(
            num_scalar_prefetch=0,
            grid=(N, R),
            in_specs=[
                pl.BlockSpec((1, Hp, Kp), lambda n, r: (n, 0, 0)),  # per-image
                const_spec((KH, Kp, Ndim)),                         # Toeplitz weight
                const_spec((Ndim, Ndim)),                           # fold matrix
                const_spec((1, Ndim)),                              # gamma (folded)
                const_spec((1, Ndim)),                              # beta  (folded)
            ],
            out_specs=pl.BlockSpec((N, Ho, Ndim), lambda n, r: (0, 0, 0)),
            scratch_shapes=[
                pltpu.VMEM((N, Ho, Ndim), jnp.float32),             # conv activations
                pltpu.VMEM((1, Ndim), jnp.float32),                 # sum
                pltpu.VMEM((1, Ndim), jnp.float32),                 # sum of squares
            ],
        )
        return pl.pallas_call(
            kernel,
            out_shape=jax.ShapeDtypeStruct((N, Ho, Ndim), x_nchw.dtype),
            grid_spec=grid_spec,
            # Global BN statistics serialize the grid -> both axes "arbitrary".
            # TODO(synk): a 2-TC (v7x) split would need a cross-core stats reduction.
            compiler_params=pltpu.CompilerParams(
                dimension_semantics=("arbitrary", "arbitrary"),
                vmem_limit_bytes=vmem_limit),
            cost_estimate=pl.CostEstimate(flops=int(flops), transcendentals=0,
                                          bytes_accessed=int(bytes_accessed)),
        )

    try:
        out_f = _build(True)(xf, T, fold, gamma_f, beta_f)
    except Exception:
        # pipeline_mode / pl.Buffered(1) unsupported on this jax version: retry
        # with default double-buffered constant operands.
        out_f = _build(False)(xf, T, fold, gamma_f, beta_f)

    # unfold lanes and return NCHW
    return jnp.transpose(out_f.reshape(N, Ho, Wo, Cout), (0, 3, 1, 2))


def _reference(x, w, gamma, beta, padding=1, eps=1e-5):
    conv = jax.lax.conv_general_dilated(
        x, w, window_strides=(1, 1), padding=[(padding, padding)] * 2,
        dimension_numbers=("NCHW", "OIHW", "NCHW"))
    mean = conv.mean(axis=(0, 2, 3), keepdims=True)
    var = jnp.square(conv - mean).mean(axis=(0, 2, 3), keepdims=True)
    y = (conv - mean) * jax.lax.rsqrt(var + eps)
    y = y * gamma.reshape(1, -1, 1, 1) + beta.reshape(1, -1, 1, 1)
    return jnp.maximum(y, 0.0)


if __name__ == "__main__":
    # BasicConv2d(in_planes=4, out_planes=8, kernel_size=3, padding=1)
    N, Cin, H, W = 2, 4, 16, 16
    Cout, KH, KW = 8, 3, 3
    padding = 1

    key = jax.random.PRNGKey(0)
    kx, kw = jax.random.split(key)

    x = jax.random.normal(kx, (N, Cin, H, W), dtype=jnp.float32)

    # Deterministic parameter init (shapes per nn.Conv2d / nn.BatchNorm2d __init__)
    bound = 1.0 / jnp.sqrt(Cin * KH * KW)
    w_conv = jax.random.uniform(kw, (Cout, Cin, KH, KW), jnp.float32, -bound, bound)
    gamma = jnp.ones((Cout,), jnp.float32)   # BatchNorm2d weight init
    beta = jnp.zeros((Cout,), jnp.float32)   # BatchNorm2d bias init

    ref = _reference(x, w_conv, gamma, beta, padding=padding)

    # Float32-operand path: tight tolerance.
    out_f32 = basic_conv2d(x, w_conv, gamma, beta, padding=padding,
                           matmul_dtype=None)
    out_f32 = jax.block_until_ready(out_f32)
    assert out_f32.shape == ref.shape == (N, Cout, H, W)
    assert jnp.allclose(out_f32, ref, rtol=1e-4, atol=1e-4), \
        f"f32 max abs err = {jnp.max(jnp.abs(out_f32 - ref))}"

    # Default bf16-operand path (f32 accumulation / BN math): looser tolerance.
    out_bf16 = basic_conv2d(x, w_conv, gamma, beta, padding=padding)
    out_bf16 = jax.block_until_ready(out_bf16)
    assert out_bf16.shape == ref.shape
    assert jnp.allclose(out_bf16, ref, rtol=5e-2, atol=5e-2), \
        f"bf16 max abs err = {jnp.max(jnp.abs(out_bf16 - ref))}"

    print("KERNEL_OK")
</pallas_src>

<mosaic_0001>
module attributes {stable_mosaic.version = 11 : i64} {
  func.func @_fused_conv_bn_relu_kernel(%arg0: i32, %arg1: i32, %arg2: memref<1x18x128xf32, #tpu.memory_space<vmem>>, %arg3: memref<3x128x128xf32, #tpu.memory_space<vmem>>, %arg4: memref<128x128xf32, #tpu.memory_space<vmem>>, %arg5: memref<1x128xf32, #tpu.memory_space<vmem>>, %arg6: memref<1x128xf32, #tpu.memory_space<vmem>>, %arg7: memref<2x16x128xf32, #tpu.memory_space<vmem>>, %arg8: memref<2x16x128xf32, #tpu.memory_space<vmem>>, %arg9: memref<1x128xf32, #tpu.memory_space<vmem>>, %arg10: memref<1x128xf32, #tpu.memory_space<vmem>>) attributes {dimension_semantics = [#tpu.dimension_semantics<arbitrary>, #tpu.dimension_semantics<arbitrary>], iteration_bounds = array<i64: 2, 1>, scalar_prefetch = 0 : i64, scratch_operands = 3 : i64, tpu.core_type = #tpu.core_type<tc>, window_params = [{transform_indices = @transform_0, window_bounds = array<i64: 1, 18, 128>}, {pipeline_mode = #tpu.pipeline_mode<synchronous>, transform_indices = @transform_1, window_bounds = array<i64: 3, 128, 128>}, {pipeline_mode = #tpu.pipeline_mode<synchronous>, transform_indices = @transform_2, window_bounds = array<i64: 128, 128>}, {pipeline_mode = #tpu.pipeline_mode<synchronous>, transform_indices = @transform_3, window_bounds = array<i64: 1, 128>}, {pipeline_mode = #tpu.pipeline_mode<synchronous>, transform_indices = @transform_4, window_bounds = array<i64: 1, 128>}, {pipeline_mode = #tpu.pipeline_mode<synchronous>, transform_indices = @transform_5, window_bounds = array<i64: 2, 16, 128>}]} {
    %c0_i32 = arith.constant 0 : i32
    %0 = arith.cmpi eq, %arg0, %c0_i32 : i32
    %c0_i32_0 = arith.constant 0 : i32
    %1 = arith.cmpi eq, %arg1, %c0_i32_0 : i32
    %2 = arith.andi %0, %1 : i1
    %c1_i32 = arith.constant 1 : i32
    %3 = arith.cmpi eq, %arg0, %c1_i32 : i32
    %c0_i32_1 = arith.constant 0 : i32
    %4 = arith.cmpi eq, %arg1, %c0_i32_1 : i32
    %5 = arith.andi %3, %4 : i1
    %6 = arith.extui %2 : i1 to i32
    %c0_i32_2 = arith.constant 0 : i32
    %7 = arith.cmpi ne, %6, %c0_i32_2 : i32
    scf.if %7 {
      %cst_30 = arith.constant 0.000000e+00 : f32
      %50 = vector.broadcast %cst_30 : f32 to vector<1x128xf32>
      %c0_31 = arith.constant 0 : index
      %c0_32 = arith.constant 0 : index
      %51 = vector.load %arg9[%c0_31, %c0_32] : memref<1x128xf32, #tpu.memory_space<vmem>>, vector<1x128xf32>
      tpu.vector_store %arg9[%c0_31, %c0_32], %50 {strides = array<i32>} : memref<1x128xf32, #tpu.memory_space<vmem>>, vector<1x128xf32>,
      %cst_33 = arith.constant 0.000000e+00 : f32
      %52 = vector.broadcast %cst_33 : f32 to vector<1x128xf32>
      %c0_34 = arith.constant 0 : index
      %c0_35 = arith.constant 0 : index
      %53 = vector.load %arg10[%c0_34, %c0_35] : memref<1x128xf32, #tpu.memory_space<vmem>>, vector<1x128xf32>
      tpu.vector_store %arg10[%c0_34, %c0_35], %52 {strides = array<i32>} : memref<1x128xf32, #tpu.memory_space<vmem>>, vector<1x128xf32>,
    } else {
    }
    %c16_i32 = arith.constant 16 : i32
    %8 = arith.muli %arg1, %c16_i32 : i32
    %9 = tpu.assume_multiple %8, 16 : i32
    %c0 = arith.constant 0 : index
    %10 = arith.index_cast %9 : i32 to index
    %c0_3 = arith.constant 0 : index
    %11 = vector.load %arg2[%c0, %10, %c0_3] : memref<1x18x128xf32, #tpu.memory_space<vmem>>, vector<1x16x128xf32>
    %12 = vector.shape_cast %11 : vector<1x16x128xf32> to vector<16x128xf32>
    %c0_4 = arith.constant 0 : index
    %c0_5 = arith.constant 0 : index
    %c0_6 = arith.constant 0 : index
    %13 = vector.load %arg3[%c0_4, %c0_5, %c0_6] : memref<3x128x128xf32, #tpu.memory_space<vmem>>, vector<1x128x128xf32>
    %14 = vector.shape_cast %13 : vector<1x128x128xf32> to vector<128x128xf32>
    %cst = arith.constant dense<0.000000e+00> : vector<16x128xf32>
    %15 = tpu.matmul %12, %14, %cst {dimension_numbers = #tpu.dot_dimension_numbers<[1], [0], [0], [1], [0, 0, 1, 1], [], []>} : vector<16x128xf32>, vector<128x128xf32>, vector<16x128xf32> -> vector<16x128xf32>
    %c1_i32_7 = arith.constant 1 : i32
    %16 = arith.addi %9, %c1_i32_7 : i32
    %c0_8 = arith.constant 0 : index
    %17 = arith.index_cast %16 : i32 to index
    %c0_9 = arith.constant 0 : index
    %18 = vector.load %arg2[%c0_8, %17, %c0_9] : memref<1x18x128xf32, #tpu.memory_space<vmem>>, vector<1x16x128xf32>
    %19 = vector.shape_cast %18 : vector<1x16x128xf32> to vector<16x128xf32>
    %c1 = arith.constant 1 : index
    %c0_10 = arith.constant 0 : index
    %c0_11 = arith.constant 0 : index
    %20 = vector.load %arg3[%c1, %c0_10, %c0_11] : memref<3x128x128xf32, #tpu.memory_space<vmem>>, vector<1x128x128xf32>
    %21 = vector.shape_cast %20 : vector<1x128x128xf32> to vector<128x128xf32>
    %cst_12 = arith.constant dense<0.000000e+00> : vector<16x128xf32>
    %22 = tpu.matmul %19, %21, %cst_12 {dimension_numbers = #tpu.dot_dimension_numbers<[1], [0], [0], [1], [0, 0, 1, 1], [], []>} : vector<16x128xf32>, vector<128x128xf32>, vector<16x128xf32> -> vector<16x128xf32>
    %23 = arith.addf %15, %22 : vector<16x128xf32>
    %c2_i32 = arith.constant 2 : i32
    %24 = arith.addi %9, %c2_i32 : i32
    %c0_13 = arith.constant 0 : index
    %25 = arith.index_cast %24 : i32 to index
    %c0_14 = arith.constant 0 : index
    %26 = vector.load %arg2[%c0_13, %25, %c0_14] : memref<1x18x128xf32, #tpu.memory_space<vmem>>, vector<1x16x128xf32>
    %27 = vector.shape_cast %26 : vector<1x16x128xf32> to vector<16x128xf32>
    %c2 = arith.constant 2 : index
    %c0_15 = arith.constant 0 : index
    %c0_16 = arith.constant 0 : index
    %28 = vector.load %arg3[%c2, %c0_15, %c0_16] : memref<3x128x128xf32, #tpu.memory_space<vmem>>, vector<1x128x128xf32>
    %29 = vector.shape_cast %28 : vector<1x128x128xf32> to vector<128x128xf32>
    %cst_17 = arith.constant dense<0.000000e+00> : vector<16x128xf32>
    %30 = tpu.matmul %27, %29, %cst_17 {dimension_numbers = #tpu.dot_dimension_numbers<[1], [0], [0], [1], [0, 0, 1, 1], [], []>} : vector<16x128xf32>, vector<128x128xf32>, vector<16x128xf32> -> vector<16x128xf32>
    %31 = arith.addf %23, %30 : vector<16x128xf32>
    %32 = arith.index_cast %arg0 : i32 to index
    %33 = arith.index_cast %9 : i32 to index
    %c0_18 = arith.constant 0 : index
    %34 = vector.load %arg8[%32, %33, %c0_18] : memref<2x16x128xf32, #tpu.memory_space<vmem>>, vector<1x16x128xf32>
    %35 = vector.shape_cast %34 : vector<1x16x128xf32> to vector<16x128xf32>
    %36 = vector.shape_cast %31 : vector<16x128xf32> to vector<1x16x128xf32>
    tpu.vector_store %arg8[%32, %33, %c0_18], %36 {strides = array<i32>} : memref<2x16x128xf32, #tpu.memory_space<vmem>>, vector<1x16x128xf32>,
    %c0_19 = arith.constant 0 : index
    %c0_20 = arith.constant 0 : index
    %37 = vector.load %arg9[%c0_19, %c0_20] : memref<1x128xf32, #tpu.memory_space<vmem>>, vector<1x128xf32>
    %cst_21 = arith.constant dense<0.000000e+00> : vector<128xf32>
    %38 = vector.multi_reduction <add>, %31, %cst_21 [0] : vector<16x128xf32> to vector<128xf32>
    %39 = vector.shape_cast %38 : vector<128xf32> to vector<1x128xf32>
    %40 = arith.addf %37, %39 : vector<1x128xf32>
    %c0_22 = arith.constant 0 : index
    %c0_23 = arith.constant 0 : index
    %41 = vector.load %arg9[%c0_22, %c0_23] : memref<1x128xf32, #tpu.memory_space<vmem>>, vector<1x128xf32>
    tpu.vector_store %arg9[%c0_22, %c0_23], %40 {strides = array<i32>} : memref<1x128xf32, #tpu.memory_space<vmem>>, vector<1x128xf32>,
    %c0_24 = arith.constant 0 : index
    %c0_25 = arith.constant 0 : index
    %42 = vector.load %arg10[%c0_24, %c0_25] : memref<1x128xf32, #tpu.memory_space<vmem>>, vector<1x128xf32>
    %43 = arith.mulf %31, %31 : vector<16x128xf32>
    %cst_26 = arith.constant dense<0.000000e+00> : vector<128xf32>
    %44 = vector.multi_reduction <add>, %43, %cst_26 [0] : vector<16x128xf32> to vector<128xf32>
    %45 = vector.shape_cast %44 : vector<128xf32> to vector<1x128xf32>
    %46 = arith.addf %42, %45 : vector<1x128xf32>
    %c0_27 = arith.constant 0 : index
    %c0_28 = arith.constant 0 : index
    %47 = vector.load %arg10[%c0_27, %c0_28] : memref<1x128xf32, #tpu.memory_space<vmem>>, vector<1x128xf32>
    tpu.vector_store %arg10[%c0_27, %c0_28], %46 {strides = array<i32>} : memref<1x128xf32, #tpu.memory_space<vmem>>, vector<1x128xf32>,
    %48 = arith.extui %5 : i1 to i32
    %c0_i32_29 = arith.constant 0 : i32
    %49 = arith.cmpi ne, %48, %c0_i32_29 : i32
    scf.if %49 {
      %c0_30 = arith.constant 0 : index
      %c0_31 = arith.constant 0 : index
      %50 = vector.load %arg9[%c0_30, %c0_31] : memref<1x128xf32, #tpu.memory_space<vmem>>, vector<1x128xf32>
      %c0_32 = arith.constant 0 : index
      %c0_33 = arith.constant 0 : index
      %51 = vector.load %arg4[%c0_32, %c0_33] : memref<128x128xf32, #tpu.memory_space<vmem>>, vector<128x128xf32>
      %cst_34 = arith.constant dense<0.000000e+00> : vector<1x128xf32>
      %52 = tpu.matmul %50, %51, %cst_34 {dimension_numbers = #tpu.dot_dimension_numbers<[1], [0], [0], [1], [0, 0, 1, 1], [], []>} : vector<1x128xf32>, vector<128x128xf32>, vector<1x128xf32> -> vector<1x128xf32>
      %c0_35 = arith.constant 0 : index
      %c0_36 = arith.constant 0 : index
      %53 = vector.load %arg10[%c0_35, %c0_36] : memref<1x128xf32, #tpu.memory_space<vmem>>, vector<1x128xf32>
      %c0_37 = arith.constant 0 : index
      %c0_38 = arith.constant 0 : index
      %54 = vector.load %arg4[%c0_37, %c0_38] : memref<128x128xf32, #tpu.memory_space<vmem>>, vector<128x128xf32>
      %cst_39 = arith.constant dense<0.000000e+00> : vector<1x128xf32>
      %55 = tpu.matmul %53, %54, %cst_39 {dimension_numbers = #tpu.dot_dimension_numbers<[1], [0], [0], [1], [0, 0, 1, 1], [], []>} : vector<1x128xf32>, vector<128x128xf32>, vector<1x128xf32> -> vector<1x128xf32>
      %cst_40 = arith.constant 0.001953125 : f32
      %56 = vector.broadcast %cst_40 : f32 to vector<1x128xf32>
      %57 = arith.mulf %52, %56 : vector<1x128xf32>
      %cst_41 = arith.constant 0.001953125 : f32
      %58 = vector.broadcast %cst_41 : f32 to vector<1x128xf32>
      %59 = arith.mulf %55, %58 : vector<1x128xf32>
      %60 = arith.mulf %57, %57 : vector<1x128xf32>
      %61 = arith.subf %59, %60 : vector<1x128xf32>
      %cst_42 = arith.constant 0.000000e+00 : f32
      %62 = vector.broadcast %cst_42 : f32 to vector<1x128xf32>
      %63 = arith.maximumf %61, %62 : vector<1x128xf32>
      %c0_43 = arith.constant 0 : index
      %c0_44 = arith.constant 0 : index
      %64 = vector.load %arg5[%c0_43, %c0_44] : memref<1x128xf32, #tpu.memory_space<vmem>>, vector<1x128xf32>
      %cst_45 = arith.constant 9.99999974E-6 : f32
      %65 = vector.broadcast %cst_45 : f32 to vector<1x128xf32>
      %66 = arith.addf %63, %65 : vector<1x128xf32>
      %67 = math.rsqrt %66 : vector<1x128xf32>
      %68 = arith.mulf %64, %67 : vector<1x128xf32>
      %c0_46 = arith.constant 0 : index
      %c0_47 = arith.constant 0 : index
      %69 = vector.load %arg6[%c0_46, %c0_47] : memref<1x128xf32, #tpu.memory_space<vmem>>, vector<1x128xf32>
      %70 = arith.mulf %57, %68 : vector<1x128xf32>
      %71 = arith.subf %69, %70 : vector<1x128xf32>
      %c0_48 = arith.constant 0 : index
      %c0_49 = arith.constant 0 : index
      %c0_50 = arith.constant 0 : index
      %72 = vector.load %arg8[%c0_48, %c0_49, %c0_50] : memref<2x16x128xf32, #tpu.memory_space<vmem>>, vector<2x16x128xf32>
      %73 = vector.shape_cast %72 : vector<2x16x128xf32> to vector<32x128xf32>
      %74 = vector.broadcast %68 : vector<1x128xf32> to vector<32x128xf32>
      %75 = arith.mulf %73, %74 : vector<32x128xf32>
      %76 = vector.broadcast %71 : vector<1x128xf32> to vector<32x128xf32>
      %77 = arith.addf %75, %76 : vector<32x128xf32>
      %cst_51 = arith.constant 0.000000e+00 : f32
      %78 = vector.broadcast %cst_51 : f32 to vector<32x128xf32>
      %79 = arith.maximumf %77, %78 : vector<32x128xf32>
      %80 = vector.shape_cast %79 : vector<32x128xf32> to vector<2x16x128xf32>
      %c0_52 = arith.constant 0 : index
      %c0_53 = arith.constant 0 : index
      %c0_54 = arith.constant 0 : index
      %81 = vector.load %arg7[%c0_52, %c0_53, %c0_54] : memref<2x16x128xf32, #tpu.memory_space<vmem>>, vector<2x16x128xf32>
      tpu.vector_store %arg7[%c0_52, %c0_53, %c0_54], %80 {strides = array<i32>} : memref<2x16x128xf32, #tpu.memory_space<vmem>>, vector<2x16x128xf32>,
    } else {
    }
    return
  }
  func.func @transform_0(%arg0: i32, %arg1: i32) -> (i32, i32, i32) {
    %c0_i32 = arith.constant 0 : i32
    %c0_i32_0 = arith.constant 0 : i32
    %c0_i32_1 = arith.constant 0 : i32
    return %arg0, %c0_i32, %c0_i32_0 : i32, i32, i32
  }
  func.func @transform_1(%arg0: i32, %arg1: i32) -> (i32, i32, i32) {
    %c0_i32 = arith.constant 0 : i32
    %c0_i32_0 = arith.constant 0 : i32
    %c0_i32_1 = arith.constant 0 : i32
    %c0_i32_2 = arith.constant 0 : i32
    return %c0_i32, %c0_i32_0, %c0_i32_1 : i32, i32, i32
  }
  func.func @transform_2(%arg0: i32, %arg1: i32) -> (i32, i32) {
    %c0_i32 = arith.constant 0 : i32
    %c0_i32_0 = arith.constant 0 : i32
    %c0_i32_1 = arith.constant 0 : i32
    return %c0_i32, %c0_i32_0 : i32, i32
  }
  func.func @transform_3(%arg0: i32, %arg1: i32) -> (i32, i32) {
    %c0_i32 = arith.constant 0 : i32
    %c0_i32_0 = arith.constant 0 : i32
    %c0_i32_1 = arith.constant 0 : i32
    return %c0_i32, %c0_i32_0 : i32, i32
  }
  func.func @transform_4(%arg0: i32, %arg1: i32) -> (i32, i32) {
    %c0_i32 = arith.constant 0 : i32
    %c0_i32_0 = arith.constant 0 : i32
    %c0_i32_1 = arith.constant 0 : i32
    return %c0_i32, %c0_i32_0 : i32, i32
  }
  func.func @transform_5(%arg0: i32, %arg1: i32) -> (i32, i32, i32) {
    %c0_i32 = arith.constant 0 : i32
    %c0_i32_0 = arith.constant 0 : i32
    %c0_i32_1 = arith.constant 0 : i32
    %c0_i32_2 = arith.constant 0 : i32
    return %c0_i32, %c0_i32_0, %c0_i32_1 : i32, i32, i32
  }
}

module attributes {stable_mosaic.version = 11 : i64} {
  func.func @_fused_conv_bn_relu_kernel(%arg0: i32, %arg1: i32, %arg2: memref<1x18x128xf32, #tpu.memory_space<vmem>>, %arg3: memref<3x128x128xf32, #tpu.memory_space<vmem>>, %arg4: memref<128x128xf32, #tpu.memory_space<vmem>>, %arg5: memref<1x128xf32, #tpu.memory_space<vmem>>, %arg6: memref<1x128xf32, #tpu.memory_space<vmem>>, %arg7: memref<2x16x128xf32, #tpu.memory_space<vmem>>, %arg8: memref<2x16x128xf32, #tpu.memory_space<vmem>>, %arg9: memref<1x128xf32, #tpu.memory_space<vmem>>, %arg10: memref<1x128xf32, #tpu.memory_space<vmem>>) attributes {dimension_semantics = [#tpu.dimension_semantics<arbitrary>, #tpu.dimension_semantics<arbitrary>], iteration_bounds = array<i64: 2, 1>, scalar_prefetch = 0 : i64, scratch_operands = 3 : i64, tpu.core_type = #tpu.core_type<tc>, window_params = [{transform_indices = @transform_0, window_bounds = array<i64: 1, 18, 128>}, {pipeline_mode = #tpu.pipeline_mode<synchronous>, transform_indices = @transform_1, window_bounds = array<i64: 3, 128, 128>}, {pipeline_mode = #tpu.pipeline_mode<synchronous>, transform_indices = @transform_2, window_bounds = array<i64: 128, 128>}, {pipeline_mode = #tpu.pipeline_mode<synchronous>, transform_indices = @transform_3, window_bounds = array<i64: 1, 128>}, {pipeline_mode = #tpu.pipeline_mode<synchronous>, transform_indices = @transform_4, window_bounds = array<i64: 1, 128>}, {pipeline_mode = #tpu.pipeline_mode<synchronous>, transform_indices = @transform_5, window_bounds = array<i64: 2, 16, 128>}]} {
    %c0_i32 = arith.constant 0 : i32
    %0 = arith.cmpi eq, %arg0, %c0_i32 : i32
    %c0_i32_0 = arith.constant 0 : i32
    %1 = arith.cmpi eq, %arg1, %c0_i32_0 : i32
    %2 = arith.andi %0, %1 : i1
    %c1_i32 = arith.constant 1 : i32
    %3 = arith.cmpi eq, %arg0, %c1_i32 : i32
    %c0_i32_1 = arith.constant 0 : i32
    %4 = arith.cmpi eq, %arg1, %c0_i32_1 : i32
    %5 = arith.andi %3, %4 : i1
    %6 = arith.extui %2 : i1 to i32
    %c0_i32_2 = arith.constant 0 : i32
    %7 = arith.cmpi ne, %6, %c0_i32_2 : i32
    scf.if %7 {
      %cst_30 = arith.constant 0.000000e+00 : f32
      %50 = vector.broadcast %cst_30 : f32 to vector<1x128xf32>
      %c0_31 = arith.constant 0 : index
      %c0_32 = arith.constant 0 : index
      %51 = vector.load %arg9[%c0_31, %c0_32] : memref<1x128xf32, #tpu.memory_space<vmem>>, vector<1x128xf32>
      tpu.vector_store %arg9[%c0_31, %c0_32], %50 {strides = array<i32>} : memref<1x128xf32, #tpu.memory_space<vmem>>, vector<1x128xf32>,
      %cst_33 = arith.constant 0.000000e+00 : f32
      %52 = vector.broadcast %cst_33 : f32 to vector<1x128xf32>
      %c0_34 = arith.constant 0 : index
      %c0_35 = arith.constant 0 : index
      %53 = vector.load %arg10[%c0_34, %c0_35] : memref<1x128xf32, #tpu.memory_space<vmem>>, vector<1x128xf32>
      tpu.vector_store %arg10[%c0_34, %c0_35], %52 {strides = array<i32>} : memref<1x128xf32, #tpu.memory_space<vmem>>, vector<1x128xf32>,
    } else {
    }
    %c16_i32 = arith.constant 16 : i32
    %8 = arith.muli %arg1, %c16_i32 : i32
    %9 = tpu.assume_multiple %8, 16 : i32
    %c0 = arith.constant 0 : index
    %10 = arith.index_cast %9 : i32 to index
    %c0_3 = arith.constant 0 : index
    %11 = vector.load %arg2[%c0, %10, %c0_3] : memref<1x18x128xf32, #tpu.memory_space<vmem>>, vector<1x16x128xf32>
    %12 = vector.shape_cast %11 : vector<1x16x128xf32> to vector<16x128xf32>
    %c0_4 = arith.constant 0 : index
    %c0_5 = arith.constant 0 : index
    %c0_6 = arith.constant 0 : index
    %13 = vector.load %arg3[%c0_4, %c0_5, %c0_6] : memref<3x128x128xf32, #tpu.memory_space<vmem>>, vector<1x128x128xf32>
    %14 = vector.shape_cast %13 : vector<1x128x128xf32> to vector<128x128xf32>
    %cst = arith.constant dense<0.000000e+00> : vector<16x128xf32>
    %15 = tpu.matmul %12, %14, %cst {dimension_numbers = #tpu.dot_dimension_numbers<[1], [0], [0], [1], [0, 0, 1, 1], [], []>} : vector<16x128xf32>, vector<128x128xf32>, vector<16x128xf32> -> vector<16x128xf32>
    %c1_i32_7 = arith.constant 1 : i32
    %16 = arith.addi %9, %c1_i32_7 : i32
    %c0_8 = arith.constant 0 : index
    %17 = arith.index_cast %16 : i32 to index
    %c0_9 = arith.constant 0 : index
    %18 = vector.load %arg2[%c0_8, %17, %c0_9] : memref<1x18x128xf32, #tpu.memory_space<vmem>>, vector<1x16x128xf32>
    %19 = vector.shape_cast %18 : vector<1x16x128xf32> to vector<16x128xf32>
    %c1 = arith.constant 1 : index
    %c0_10 = arith.constant 0 : index
    %c0_11 = arith.constant 0 : index
    %20 = vector.load %arg3[%c1, %c0_10, %c0_11] : memref<3x128x128xf32, #tpu.memory_space<vmem>>, vector<1x128x128xf32>
    %21 = vector.shape_cast %20 : vector<1x128x128xf32> to vector<128x128xf32>
    %cst_12 = arith.constant dense<0.000000e+00> : vector<16x128xf32>
    %22 = tpu.matmul %19, %21, %cst_12 {dimension_numbers = #tpu.dot_dimension_numbers<[1], [0], [0], [1], [0, 0, 1, 1], [], []>} : vector<16x128xf32>, vector<128x128xf32>, vector<16x128xf32> -> vector<16x128xf32>
    %23 = arith.addf %15, %22 : vector<16x128xf32>
    %c2_i32 = arith.constant 2 : i32
    %24 = arith.addi %9, %c2_i32 : i32
    %c0_13 = arith.constant 0 : index
    %25 = arith.index_cast %24 : i32 to index
    %c0_14 = arith.constant 0 : index
    %26 = vector.load %arg2[%c0_13, %25, %c0_14] : memref<1x18x128xf32, #tpu.memory_space<vmem>>, vector<1x16x128xf32>
    %27 = vector.shape_cast %26 : vector<1x16x128xf32> to vector<16x128xf32>
    %c2 = arith.constant 2 : index
    %c0_15 = arith.constant 0 : index
    %c0_16 = arith.constant 0 : index
    %28 = vector.load %arg3[%c2, %c0_15, %c0_16] : memref<3x128x128xf32, #tpu.memory_space<vmem>>, vector<1x128x128xf32>
    %29 = vector.shape_cast %28 : vector<1x128x128xf32> to vector<128x128xf32>
    %cst_17 = arith.constant dense<0.000000e+00> : vector<16x128xf32>
    %30 = tpu.matmul %27, %29, %cst_17 {dimension_numbers = #tpu.dot_dimension_numbers<[1], [0], [0], [1], [0, 0, 1, 1], [], []>} : vector<16x128xf32>, vector<128x128xf32>, vector<16x128xf32> -> vector<16x128xf32>
    %31 = arith.addf %23, %30 : vector<16x128xf32>
    %32 = arith.index_cast %arg0 : i32 to index
    %33 = arith.index_cast %9 : i32 to index
    %c0_18 = arith.constant 0 : index
    %34 = vector.load %arg8[%32, %33, %c0_18] : memref<2x16x128xf32, #tpu.memory_space<vmem>>, vector<1x16x128xf32>
    %35 = vector.shape_cast %34 : vector<1x16x128xf32> to vector<16x128xf32>
    %36 = vector.shape_cast %31 : vector<16x128xf32> to vector<1x16x128xf32>
    tpu.vector_store %arg8[%32, %33, %c0_18], %36 {strides = array<i32>} : memref<2x16x128xf32, #tpu.memory_space<vmem>>, vector<1x16x128xf32>,
    %c0_19 = arith.constant 0 : index
    %c0_20 = arith.constant 0 : index
    %37 = vector.load %arg9[%c0_19, %c0_20] : memref<1x128xf32, #tpu.memory_space<vmem>>, vector<1x128xf32>
    %cst_21 = arith.constant dense<0.000000e+00> : vector<128xf32>
    %38 = vector.multi_reduction <add>, %31, %cst_21 [0] : vector<16x128xf32> to vector<128xf32>
    %39 = vector.shape_cast %38 : vector<128xf32> to vector<1x128xf32>
    %40 = arith.addf %37, %39 : vector<1x128xf32>
    %c0_22 = arith.constant 0 : index
    %c0_23 = arith.constant 0 : index
    %41 = vector.load %arg9[%c0_22, %c0_23] : memref<1x128xf32, #tpu.memory_space<vmem>>, vector<1x128xf32>
    tpu.vector_store %arg9[%c0_22, %c0_23], %40 {strides = array<i32>} : memref<1x128xf32, #tpu.memory_space<vmem>>, vector<1x128xf32>,
    %c0_24 = arith.constant 0 : index
    %c0_25 = arith.constant 0 : index
    %42 = vector.load %arg10[%c0_24, %c0_25] : memref<1x128xf32, #tpu.memory_space<vmem>>, vector<1x128xf32>
    %43 = arith.mulf %31, %31 : vector<16x128xf32>
    %cst_26 = arith.constant dense<0.000000e+00> : vector<128xf32>
    %44 = vector.multi_reduction <add>, %43, %cst_26 [0] : vector<16x128xf32> to vector<128xf32>
    %45 = vector.shape_cast %44 : vector<128xf32> to vector<1x128xf32>
    %46 = arith.addf %42, %45 : vector<1x128xf32>
    %c0_27 = arith.constant 0 : index
    %c0_28 = arith.constant 0 : index
    %47 = vector.load %arg10[%c0_27, %c0_28] : memref<1x128xf32, #tpu.memory_space<vmem>>, vector<1x128xf32>
    tpu.vector_store %arg10[%c0_27, %c0_28], %46 {strides = array<i32>} : memref<1x128xf32, #tpu.memory_space<vmem>>, vector<1x128xf32>,
    %48 = arith.extui %5 : i1 to i32
    %c0_i32_29 = arith.constant 0 : i32
    %49 = arith.cmpi ne, %48, %c0_i32_29 : i32
    scf.if %49 {
      %c0_30 = arith.constant 0 : index
      %c0_31 = arith.constant 0 : index
      %50 = vector.load %arg9[%c0_30, %c0_31] : memref<1x128xf32, #tpu.memory_space<vmem>>, vector<1x128xf32>
      %c0_32 = arith.constant 0 : index
      %c0_33 = arith.constant 0 : index
      %51 = vector.load %arg4[%c0_32, %c0_33] : memref<128x128xf32, #tpu.memory_space<vmem>>, vector<128x128xf32>
      %cst_34 = arith.constant dense<0.000000e+00> : vector<1x128xf32>
      %52 = tpu.matmul %50, %51, %cst_34 {dimension_numbers = #tpu.dot_dimension_numbers<[1], [0], [0], [1], [0, 0, 1, 1], [], []>} : vector<1x128xf32>, vector<128x128xf32>, vector<1x128xf32> -> vector<1x128xf32>
      %c0_35 = arith.constant 0 : index
      %c0_36 = arith.constant 0 : index
      %53 = vector.load %arg10[%c0_35, %c0_36] : memref<1x128xf32, #tpu.memory_space<vmem>>, vector<1x128xf32>
      %c0_37 = arith.constant 0 : index
      %c0_38 = arith.constant 0 : index
      %54 = vector.load %arg4[%c0_37, %c0_38] : memref<128x128xf32, #tpu.memory_space<vmem>>, vector<128x128xf32>
      %cst_39 = arith.constant dense<0.000000e+00> : vector<1x128xf32>
      %55 = tpu.matmul %53, %54, %cst_39 {dimension_numbers = #tpu.dot_dimension_numbers<[1], [0], [0], [1], [0, 0, 1, 1], [], []>} : vector<1x128xf32>, vector<128x128xf32>, vector<1x128xf32> -> vector<1x128xf32>
      %cst_40 = arith.constant 0.001953125 : f32
      %56 = vector.broadcast %cst_40 : f32 to vector<1x128xf32>
      %57 = arith.mulf %52, %56 : vector<1x128xf32>
      %cst_41 = arith.constant 0.001953125 : f32
      %58 = vector.broadcast %cst_41 : f32 to vector<1x128xf32>
      %59 = arith.mulf %55, %58 : vector<1x128xf32>
      %60 = arith.mulf %57, %57 : vector<1x128xf32>
      %61 = arith.subf %59, %60 : vector<1x128xf32>
      %cst_42 = arith.constant 0.000000e+00 : f32
      %62 = vector.broadcast %cst_42 : f32 to vector<1x128xf32>
      %63 = arith.maximumf %61, %62 : vector<1x128xf32>
      %c0_43 = arith.constant 0 : index
      %c0_44 = arith.constant 0 : index
      %64 = vector.load %arg5[%c0_43, %c0_44] : memref<1x128xf32, #tpu.memory_space<vmem>>, vector<1x128xf32>
      %cst_45 = arith.constant 9.99999974E-6 : f32
      %65 = vector.broadcast %cst_45 : f32 to vector<1x128xf32>
      %66 = arith.addf %63, %65 : vector<1x128xf32>
      %67 = math.rsqrt %66 : vector<1x128xf32>
      %68 = arith.mulf %64, %67 : vector<1x128xf32>
      %c0_46 = arith.constant 0 : index
      %c0_47 = arith.constant 0 : index
      %69 = vector.load %arg6[%c0_46, %c0_47] : memref<1x128xf32, #tpu.memory_space<vmem>>, vector<1x128xf32>
      %70 = arith.mulf %57, %68 : vector<1x128xf32>
      %71 = arith.subf %69, %70 : vector<1x128xf32>
      %c0_48 = arith.constant 0 : index
      %c0_49 = arith.constant 0 : index
      %c0_50 = arith.constant 0 : index
      %72 = vector.load %arg8[%c0_48, %c0_49, %c0_50] : memref<2x16x128xf32, #tpu.memory_space<vmem>>, vector<2x16x128xf32>
      %73 = vector.shape_cast %72 : vector<2x16x128xf32> to vector<32x128xf32>
      %74 = vector.broadcast %68 : vector<1x128xf32> to vector<32x128xf32>
      %75 = arith.mulf %73, %74 : vector<32x128xf32>
      %76 = vector.broadcast %71 : vector<1x128xf32> to vector<32x128xf32>
      %77 = arith.addf %75, %76 : vector<32x128xf32>
      %cst_51 = arith.constant 0.000000e+00 : f32
      %78 = vector.broadcast %cst_51 : f32 to vector<32x128xf32>
      %79 = arith.maximumf %77, %78 : vector<32x128xf32>
      %80 = vector.shape_cast %79 : vector<32x128xf32> to vector<2x16x128xf32>
      %c0_52 = arith.constant 0 : index
      %c0_53 = arith.constant 0 : index
      %c0_54 = arith.constant 0 : index
      %81 = vector.load %arg7[%c0_52, %c0_53, %c0_54] : memref<2x16x128xf32, #tpu.memory_space<vmem>>, vector<2x16x128xf32>
      tpu.vector_store %arg7[%c0_52, %c0_53, %c0_54], %80 {strides = array<i32>} : memref<2x16x128xf32, #tpu.memory_space<vmem>>, vector<2x16x128xf32>,
    } else {
    }
    return
  }
  func.func @transform_0(%arg0: i32, %arg1: i32) -> (i32, i32, i32) {
    %c0_i32 = arith.constant 0 : i32
    %c0_i32_0 = arith.constant 0 : i32
    %c0_i32_1 = arith.constant 0 : i32
    return %arg0, %c0_i32, %c0_i32_0 : i32, i32, i32
  }
  func.func @transform_1(%arg0: i32, %arg1: i32) -> (i32, i32, i32) {
    %c0_i32 = arith.constant 0 : i32
    %c0_i32_0 = arith.constant 0 : i32
    %c0_i32_1 = arith.constant 0 : i32
    %c0_i32_2 = arith.constant 0 : i32
    return %c0_i32, %c0_i32_0, %c0_i32_1 : i32, i32, i32
  }
  func.func @transform_2(%arg0: i32, %arg1: i32) -> (i32, i32) {
    %c0_i32 = arith.constant 0 : i32
    %c0_i32_0 = arith.constant 0 : i32
    %c0_i32_1 = arith.constant 0 : i32
    return %c0_i32, %c0_i32_0 : i32, i32
  }
  func.func @transform_3(%arg0: i32, %arg1: i32) -> (i32, i32) {
    %c0_i32 = arith.constant 0 : i32
    %c0_i32_0 = arith.constant 0 : i32
    %c0_i32_1 = arith.constant 0 : i32
    return %c0_i32, %c0_i32_0 : i32, i32
  }
  func.func @transform_4(%arg0: i32, %arg1: i32) -> (i32, i32) {
    %c0_i32 = arith.constant 0 : i32
    %c0_i32_0 = arith.constant 0 : i32
    %c0_i32_1 = arith.constant 0 : i32
    return %c0_i32, %c0_i32_0 : i32, i32
  }
  func.func @transform_5(%arg0: i32, %arg1: i32) -> (i32, i32, i32) {
    %c0_i32 = arith.constant 0 : i32
    %c0_i32_0 = arith.constant 0 : i32
    %c0_i32_1 = arith.constant 0 : i32
    %c0_i32_2 = arith.constant 0 : i32
    return %c0_i32, %c0_i32_0, %c0_i32_1 : i32, i32, i32
  }
}

</mosaic_0001>

<bundles_post_ra>
// kernel: tpu_custom_call.1
= control target key start
LH: loop header
LB: loop body
LE: loop exit
PB: predicated region body
PF: predicated region fallthrough
CT: control target
= control target key end

     0   :  { %10 = vsyncpa [#allocation6], 0  ;;  %s1689_s0 = inlined_call_operand.vmem [shape: f32[2,18,128], index: 0, kind: input, shape index: {}]   ;;  %s1690_s1 = inlined_call_operand.hbm [shape: f32[3,128,128], index: 1, kind: input, shape index: {}]   ;;  %s1691_s2 = inlined_call_operand.hbm [shape: f32[128,128], index: 2, kind: input, shape index: {}]   ;;  %s1692_s3 = inlined_call_operand.vmem [shape: f32[1,128], index: 3, kind: input, shape index: {}]   ;;  %s1693_s4 = inlined_call_operand.vmem [shape: f32[1,128], index: 4, kind: input, shape index: {}]   ;;  %s1694_s5 = inlined_call_operand.hbm [shape: f32[2,16,128], index: 5, kind: output, shape index: {}]  }
   0x1   :  { %11 = vsyncpa [#allocation9], 0 }
   0x2   :  { %12 = vsyncpa [#allocation7], 0  ;;  %s1530_s18 = smov 0   ;;  %s1532_s19 = smov 0  }
   0x3   :  { %s1534_s20 = smov 0  }
   0x4 LB: > { %s875_s21 = sadd.s32 4294967295, %s1487_s20   ;;  %s30_s22 = sadd.s32 1, %s1483_s19  ;;  %s1487_s20 = sphi %s1534_s20, %s18_s20   ;;  %s1483_s19 = sphi %s1532_s19, %s1705_s19   ;;  %s1479_s18 = sphi %s1530_s18, %s1704_s18  }
   0x5   : > { %p32_p0 = scmp.ge.s32.totalorder %s30_s22, 2  ;;  %p876_p1 = scmp.ge.s32.totalorder %s1487_s20, 1 }
   0x6   : > { %p166_p2 = scmp.lt.s32.totalorder %s1487_s20, 3  ;;  %p1557_p4 = scmp.eq.s32.totalorder %s875_s21, 0 }
   0x7   : > { %s1707_s22 = smov (%p32_p0, %s30_s22), 0  ;;  %s1489_s25 = smov [#allocation5]  }
   0x8   : > { %p1551_p3 = pnand %p876_p1, %p166_p2  ;;  %s178_s26 = sshll.u32 %s1489_s25, 4  ;;  %s179_s26 = int_to_ptr.vmem [resolvable:$true] %s178_s26 }
   0x9   : > { %s1699_s24 = scalar_select %p1557_p4, 1, 0 }
   0xa   : > { %s1698_s23 = scalar_select %p1551_p3, 1, 0 }
   0xb   : > { %p1321_p5 = pneg %p1551_p3  ;;  %s1490_s28 = smov [#allocation8]  }
   0xc   : > { %s191_s29 = sshll.u32 %s1490_s28, 4  ;;  %s1371_s7 = scalar_lea.hbm %s1690_s1, 6144  ;;  %s1569_s29 = int_to_ptr.vmem [resolvable:$true] %s191_s29 }
   0xd   : > { %p1565_p6 = pnand %p1557_p4, %p1321_p5  ;;  %p1372_p7 = scmp.ne.s32.totalorder %s1690_s1, %s1371_s7 }
   0xe   : > { %p1378_p11 = scmp.lt.u32.totalorder %s1371_s7, %s1690_s1 }
   0xf   : > { %p1373_p8 = pneg %p1565_p6 }
  0x11   : > { %p1374_p9 = pnand %p1373_p8, %p1372_p7 }
  0x13   : > { %p1375_p10 = pneg %p1374_p9 }
  0x15   : > { %p1380_p12 = pnand %p1378_p11, %p1375_p10 }
  0x17   : > { %1383 = shalt.err (!%p1380_p12)
}
  0x18   : > { %s1384_s12 = scalar_lea.vmem %s179_s26, 6144  ;;  %p1392_p2 = scmp.lt.s32.totalorder %s179_s26, %s179_s26 }
  0x19   : > { %p1385_p13 = scmp.ne.s32.totalorder %s179_s26, %s1384_s12  ;;  %p1393_p5 = scmp.lt.s32.totalorder %s1384_s12, %s1384_s12 }
  0x1b   : > { %p1387_p0 = pnand %p1385_p13, %p1373_p8  ;;  %p1394_p4 = por %p1393_p5, %p1392_p2 }
  0x1d   : > { %p1388_p1 = pneg %p1387_p0 }
  0x1f   : > { %p1395_p3 = pnand %p1394_p4, %p1388_p1 }
  0x21   : > { %1398 = shalt.err (!%p1395_p3)
}
  0x22   : > { %s1491_s13 = smov 128   ;;  %s1492_s14 = smov 8  }
  0x23   : > { %1324 = dma.hbm_to_vmem [thread:$0]  (!%p1565_p6), %s1690_s1, 6144, %s179_s26, [#allocation6], %s1491_s13, %s1491_s13, %s1492_s14  }
  0x24   : > { %s1399_s28 = scalar_lea.hbm %s1691_s2, 2048 }
  0x25   : > { %p1400_p7 = scmp.ne.s32.totalorder %s1691_s2, %s1399_s28  ;;  %p1406_p9 = scmp.lt.u32.totalorder %s1399_s28, %s1691_s2 }
  0x27   : > { %p1402_p3 = pnand %p1400_p7, %p1373_p8 }
  0x29   : > { %p1403_p4 = pneg %p1402_p3 }
  0x2b   : > { %p1408_p10 = pnand %p1406_p9, %p1403_p4 }
  0x2d   : > { %1411 = shalt.err (!%p1408_p10)
}
  0x2e   : > { %s1412_s26 = scalar_lea.vmem %s1569_s29, 2048  ;;  %p1420_p0 = scmp.lt.s32.totalorder %s1569_s29, %s1569_s29 }
  0x2f   : > { %p1413_p11 = scmp.ne.s32.totalorder %s1569_s29, %s1412_s26  ;;  %p1421_p1 = scmp.lt.s32.totalorder %s1412_s26, %s1412_s26 }
  0x31   : > { %p1415_p12 = pnand %p1413_p11, %p1373_p8  ;;  %p1422_p2 = por %p1421_p1, %p1420_p0 }
  0x33   : > { %p1416_p13 = pneg %p1415_p12 }
  0x35   : > { %p1423_p5 = pnand %p1422_p2, %p1416_p13 }
  0x37   : > { %1426 = shalt.err (!%p1423_p5)
}
  0x38   : > { %1327 = dma.hbm_to_vmem [thread:$0]  (!%p1565_p6), %s1691_s2, 2048, %s1569_s29, [#allocation9], %s1491_s13, %s1491_s13, %s1492_s14  }
  0x39   : > { %p1701_p7 = scmp.ne.s32.totalorder %s1698_s23, 0 }
  0x3a   : > { %p1702_p3 = scmp.ne.s32.totalorder (!%p1701_p7), %s1699_s24, 0 }
  0x3b   : > { %221 = sbr.rel (%p1701_p7) target bundleno = 658 (0x292), region = 40 }
  0x42   : > { %1466 = dma.done.wait (%p1702_p3), [#allocation6], 6144  }
  0x43   : > { %1468 = vsyncadd (%p1702_p3), [#allocation6], 4294961152 }
  0x44   : > { %1470 = dma.done.wait (%p1702_p3), [#allocation9], 2048  }
  0x45   : > { %1472 = vsyncadd (%p1702_p3), [#allocation9], 4294965248  ;;  %p248_p6 = scmp.lt.s32.totalorder %s1479_s18, 1  ;;  %p253_p8 = scmp.eq.s32.totalorder %s1479_s18, 0 }
  0x46   : > { %p257_p4 = scmp.eq.s32.totalorder %s1479_s18, 1  ;;  %v1493_v0 = vmov (%p253_p8), 0.0  }
  0x47   : > { %s249_s23 = scalar_select %p248_p6, %s1479_s18, 1 }
  0x48   : > { %261 = sbr.rel (!%p253_p8) target bundleno = 79 (0x4f), region = 52  ;;  %262 = vst [vmem:[#allocation3] sm:$0x1] (%p253_p8), %v1493_v0  ;;  %263 = vst [vmem:[#allocation4] sm:$0x1] (%p253_p8), %v1493_v0 }
  0x49   : > { %s1308_s27 = smul.u32 24, %s249_s23 }
  0x4b   : > { %s1635_s12 = scalar_lea.vmem %s1689_s0, %s1308_s27 }
  0x4f PF: > { %v268_v1 = vld [vmem:[#allocation5] sm:$0xff]  ;;  %v269_v2 = vld [vmem:[#allocation5 + $0x8] sm:$0xff]  ;;  %v270_v3 = vld [vmem:[#allocation5 + $0x10] sm:$0xff]  ;;  %s890_s24 = sshll.u32 %s1479_s18, 4  ;;  %vm1495_vm0 = vmmov (%p257_p4), 0  }
  0x50   : > { %v1192_v4 = vpack.c.bf16 %v269_v2, %v268_v1  ;;  %v271_v5 = vld [vmem:[#allocation5 + $0x18] sm:$0xff]  ;;  %v272_v7 = vld [vmem:[#allocation5 + $0x20] sm:$0xff]  ;;  %v273_v8 = vld [vmem:[#allocation5 + $0x28] sm:$0xff]  ;;  %s555_s13 = scalar_lea.vmem [#allocation2], %s890_s24 }
  0x51   : > { %v1196_v6 = vpack.c.bf16 %v271_v5, %v270_v3  ;;  %v1200_v9 = vpack.c.bf16 %v273_v8, %v272_v7  ;;  %v289_v10 = vld [vmem:[#allocation5 + $0x80] sm:$0xff]  ;;  %v290_v11 = vld [vmem:[#allocation5 + $0x88] sm:$0xff]  ;;  %v274_v12 = vld [vmem:[#allocation5 + $0x30] sm:$0xff] }
  0x52   : > { %1193 = vmatprep.subr.bf16.mxu0 %v1192_v4  ;;  %v275_v13 = vld [vmem:[#allocation5 + $0x38] sm:$0xff]  ;;  %v1160_v14 = vpack.c.bf16 %v290_v11, %v289_v10  ;;  %v291_v16 = vld [vmem:[#allocation5 + $0x90] sm:$0xff]  ;;  %v293_v19 = vld [vmem:[#allocation5 + $0xa0] sm:$0xff] }
  0x53   : > { %1195 = vmatpush3.bf16.msra.mxu0 %v1192_v4  ;;  %v266_v15 = vld [vmem:[%s1635_s12] sm:$0xff]  ;;  %v1204_v20 = vpack.c.bf16 %v275_v13, %v274_v12  ;;  %v294_v21 = vld [vmem:[#allocation5 + $0xa8] sm:$0xff]  ;;  %v295_v25 = vld [vmem:[#allocation5 + $0xb0] sm:$0xff] }
  0x54   : > { %1197 = vmatprep.subr.bf16.mxu0 %v1196_v6  ;;  %1052 = vmatprep.mubr.f32.mxu0 %v266_v15  ;;  %v292_v17 = vld [vmem:[#allocation5 + $0x98] sm:$0xff]  ;;  %v276_v22 = vld [vmem:[#allocation5 + $0x40] sm:$0xff]  ;;  %v277_v23 = vld [vmem:[#allocation5 + $0x48] sm:$0xff]  ;;  %v1168_v24 = vpack.c.bf16 %v294_v21, %v293_v19 }
  0x55   : > { %1161 = vmatprep.subr.bf16.mxu1 %v1160_v14  ;;  %v1164_v18 = vpack.c.bf16 %v292_v17, %v291_v16  ;;  %v296_v26 = vld [vmem:[#allocation5 + $0xb8] sm:$0xff]  ;;  %v1208_v27 = vpack.c.bf16 %v277_v23, %v276_v22  ;;  %v278_v28 = vld [vmem:[#allocation5 + $0x50] sm:$0xff]  ;;  %v297_v31 = vld [vmem:[#allocation5 + $0xc0] sm:$0xff] }
  0x56   : > { %1163 = vmatpush3.bf16.msra.mxu1 %v1160_v14  ;;  %v279_v29 = vld [vmem:[#allocation5 + $0x58] sm:$0xff]  ;;  %v1172_v30 = vpack.c.bf16 %v296_v26, %v295_v25  ;;  %v298_v32 = vld [vmem:[#allocation5 + $0xc8] sm:$0xff]  ;;  %v280_v35 = vld [vmem:[#allocation5 + $0x60] sm:$0xff] }
  0x57   : > { %1199 = vmatpush3.bf16.msra.mxu0 %v1196_v6  ;;  %1165 = vmatprep.subr.bf16.mxu1 %v1164_v18  ;;  %v886_v33 = vld [vmem:[%s1635_s12 + $0x1] sm:$0xff]  ;;  %v1212_v34 = vpack.c.bf16 %v279_v29, %v278_v28  ;;  %v281_v36 = vld [vmem:[#allocation5 + $0x68] sm:$0xff]  ;;  %v1176_v37 = vpack.c.bf16 %v298_v32, %v297_v31  ;;  %v299_v38 = vld [vmem:[#allocation5 + $0xd0] sm:$0xff] }
  0x58   : > { %1201 = vmatprep.subr.bf16.mxu0 %v1200_v9  ;;  %1017 = vmatprep.mubr.f32.mxu1 %v886_v33  ;;  %v300_v39 = vld [vmem:[#allocation5 + $0xd8] sm:$0xff]  ;;  %v1216_v40 = vpack.c.bf16 %v281_v36, %v280_v35  ;;  %v282_v41 = vld [vmem:[#allocation5 + $0x70] sm:$0xff]  ;;  %v301_v44 = vld [vmem:[#allocation5 + $0xe0] sm:$0xff] }
  0x59   : > { %v283_v42 = vld [vmem:[#allocation5 + $0x78] sm:$0xff]  ;;  %v1180_v43 = vpack.c.bf16 %v300_v39, %v299_v38  ;;  %v302_v45 = vld [vmem:[#allocation5 + $0xe8] sm:$0xff]  ;;  %v460_v47 = vld [vmem:[#allocation5 + $0x100] sm:$0xff] }
  0x5a   : > { %1167 = vmatpush3.bf16.msra.mxu1 %v1164_v18  ;;  %v1220_v46 = vpack.c.bf16 %v283_v42, %v282_v41  ;;  %v461_v48 = vld [vmem:[#allocation5 + $0x108] sm:$0xff]  ;;  %v1184_v49 = vpack.c.bf16 %v302_v45, %v301_v44  ;;  %v303_v50 = vld [vmem:[#allocation5 + $0xf0] sm:$0xff]  ;;  %v304_v51 = vld [vmem:[#allocation5 + $0xf8] sm:$0xff]  ;;  %v1494_v44 = vmov (%p257_p4), 0.0|0.0  }
  0x5b   : > { %1203 = vmatpush3.bf16.msra.mxu0 %v1200_v9  ;;  %1169 = vmatprep.subr.bf16.mxu1 %v1168_v24  ;;  %v1224_v52 = vpack.c.bf16 %v461_v48, %v460_v47  ;;  %v462_v53 = vld [vmem:[#allocation5 + $0x110] sm:$0xff]  ;;  %v463_v54 = vld [vmem:[#allocation5 + $0x118] sm:$0xff]  ;;  %v1188_v55 = vpack.c.bf16 %v304_v51, %v303_v50  ;;  %v267_v56 = vld [vmem:[%s1635_s12 + $0x8] sm:$0xff]  ;;  %v1496_v47 = vmov (%p257_p4), 0.0  }
  0x5c   : > { %1205 = vmatprep.subr.bf16.mxu0 %v1204_v20  ;;  %v1228_v57 = vpack.c.bf16 %v463_v54, %v462_v53  ;;  %v888_v58 = vld [vmem:[%s1635_s12 + $0x2] sm:$0xff]  ;;  %v465_v60 = vld [vmem:[#allocation5 + $0x128] sm:$0xff]  ;;  %v466_v63 = vld [vmem:[#allocation5 + $0x130] sm:$0xff] }
  0x5d   : > { %v464_v59 = vld [vmem:[#allocation5 + $0x120] sm:$0xff]  ;;  %v467_v0 = vld [vmem:[#allocation5 + $0x138] sm:$0xff]  ;;  %v469_v3 = vld [vmem:[#allocation5 + $0x148] sm:$0xff] }
  0x5e   : > { %1171 = vmatpush3.bf16.msra.mxu1 %v1168_v24  ;;  %v1232_v61 = vpack.c.bf16 %v465_v60, %v464_v59  ;;  %v887_v62 = vld [vmem:[%s1635_s12 + $0x9] sm:$0xff]  ;;  %v1236_v1 = vpack.c.bf16 %v467_v0, %v466_v63  ;;  %v470_v5 = vld [vmem:[#allocation5 + $0x150] sm:$0xff]  ;;  %v471_v6 = vld [vmem:[#allocation5 + $0x158] sm:$0xff] }
  0x5f   : > { %1207 = vmatpush3.bf16.msra.mxu0 %v1204_v20  ;;  %1173 = vmatprep.subr.bf16.mxu1 %v1172_v30  ;;  %v468_v2 = vld [vmem:[#allocation5 + $0x140] sm:$0xff]  ;;  %v1244_v7 = vpack.c.bf16 %v471_v6, %v470_v5  ;;  %v473_v9 = vld [vmem:[#allocation5 + $0x168] sm:$0xff]  ;;  %v474_v11 = vld [vmem:[#allocation5 + $0x170] sm:$0xff] }
  0x60   : > { %1209 = vmatprep.subr.bf16.mxu0 %v1208_v27  ;;  %v1240_v4 = vpack.c.bf16 %v469_v3, %v468_v2  ;;  %v472_v8 = vld [vmem:[#allocation5 + $0x160] sm:$0xff]  ;;  %v475_v12 = vld [vmem:[#allocation5 + $0x178] sm:$0xff]  ;;  %v889_v14 = vld [vmem:[%s1635_s12 + $0xa] sm:$0xff] }
  0x61   : > { %v1248_v10 = vpack.c.bf16 %v473_v9, %v472_v8  ;;  %v1252_v13 = vpack.c.bf16 %v475_v12, %v474_v11  ;;  %v583_v41 = vld [vmem:[#allocation8] sm:$0xff] (%p257_p4)  ;;  %v584_v42 = vld [vmem:[#allocation8 + $0x8] sm:$0xff] (%p257_p4)  ;;  %v590_v53 = vld [vmem:[#allocation8 + $0x38] sm:$0xff] (%p257_p4) }
  0x62   : > { %1175 = vmatpush3.bf16.msra.mxu1 %v1172_v30  ;;  %v1257_v45 = vpack.c.bf16 (%p257_p4), %v584_v42, %v583_v41  ;;  %v588_v50 = vld [vmem:[#allocation8 + $0x28] sm:$0xff] (%p257_p4)  ;;  %v594_v59 = vld [vmem:[#allocation8 + $0x58] sm:$0xff] (%p257_p4)  ;;  %v597_v0 = vld [vmem:[#allocation8 + $0x70] sm:$0xff] (%p257_p4) }
  0x63   : > { %1211 = vmatpush3.bf16.msra.mxu0 %v1208_v27  ;;  %1177 = vmatprep.subr.bf16.mxu1 %v1176_v37 }
  0x64   : > { %1213 = vmatprep.subr.bf16.mxu0 %v1212_v34 }
  0x66   : > { %1179 = vmatpush3.bf16.msra.mxu1 %v1176_v37  ;;  %v568_v37 = vld [vmem:[#allocation4] sm:$0x1] }
  0x67   : > { %1215 = vmatpush3.bf16.msra.mxu0 %v1212_v34  ;;  %1181 = vmatprep.subr.bf16.mxu1 %v1180_v43  ;;  %v558_v34 = vld [vmem:[#allocation3] sm:$0x1] }
  0x68   : > { %1217 = vmatprep.subr.bf16.mxu0 %v1216_v40 }
  0x6a   : > { %1183 = vmatpush3.bf16.msra.mxu1 %v1180_v43  ;;  %v585_v43 = vld [vmem:[#allocation8 + $0x10] sm:$0xff] (%p257_p4) }
  0x6b   : > { %1219 = vmatpush3.bf16.msra.mxu0 %v1216_v40  ;;  %1185 = vmatprep.subr.bf16.mxu1 %v1184_v49 }
  0x6c   : > { %1221 = vmatprep.subr.bf16.mxu0 %v1220_v46 }
  0x6e   : > { %1187 = vmatpush3.bf16.msra.mxu1 %v1184_v49  ;;  %v587_v49 = vld [vmem:[#allocation8 + $0x20] sm:$0xff] (%p257_p4) }
  0x6f   : > { %1223 = vmatpush3.bf16.msra.mxu0 %v1220_v46  ;;  %1189 = vmatprep.subr.bf16.mxu1 %v1188_v55  ;;  %v586_v46 = vld [vmem:[#allocation8 + $0x18] sm:$0xff] (%p257_p4)  ;;  %v1263_v51 = vpack.c.bf16 (%p257_p4), %v588_v50, %v587_v49 }
  0x70   : > { %1225 = vmatprep.subr.bf16.mxu0 %v1224_v52  ;;  %v1260_v48 = vpack.c.bf16 (%p257_p4), %v586_v46, %v585_v43 }
  0x72   : > { %1053 = vmatmul.mubr.f32.vlgmr.msra.gmra.mrb[0].mxu0 %v267_v56  ;;  %1191 = vmatpush3.bf16.msra.mxu1 %v1188_v55  ;;  %v591_v55 = vld [vmem:[#allocation8 + $0x40] sm:$0xff] (%p257_p4)  ;;  %v592_v56 = vld [vmem:[#allocation8 + $0x48] sm:$0xff] (%p257_p4) }
  0x73   : > { %1227 = vmatpush3.bf16.msra.mxu0 %v1224_v52  ;;  %1087 = vmatprep.mubr.f32.mxu0 %v888_v58  ;;  %v589_v52 = vld [vmem:[#allocation8 + $0x30] sm:$0xff] (%p257_p4) }
  0x74   : > { %1229 = vmatprep.subr.bf16.mxu0 %v1228_v57  ;;  %1280 = vmatprep.subr.bf16.mxu1 (%p257_p4), %v1494_v44  ;;  %v1266_v54 = vpack.c.bf16 (%p257_p4), %v590_v53, %v589_v52  ;;  %v593_v58 = vld [vmem:[#allocation8 + $0x50] sm:$0xff] (%p257_p4) }
  0x75   : > { %1018 = vmatmul.mubr.f32.vlgmr.msra.gmra.mrb[0].mxu1 %v887_v62  ;;  %v1272_v60 = vpack.c.bf16 (%p257_p4), %v594_v59, %v593_v58  ;;  %v596_v62 = vld [vmem:[#allocation8 + $0x68] sm:$0xff] (%p257_p4) }
  0x76   : > { %1157 = vmatprep.mubr.msk.f32.mxu1 (%p257_p4), %vm1495_vm0, %v1496_v47  ;;  %1282 = vmatpush3.bf16.msra.mxu1 (%p257_p4), %v1257_v45 }
  0x77   : > { %1231 = vmatpush3.bf16.msra.mxu0 %v1228_v57  ;;  %1283 = vmatprep.subr.bf16.mxu1 (%p257_p4), %v1494_v44  ;;  %v1269_v57 = vpack.c.bf16 (%p257_p4), %v592_v56, %v591_v55 }
  0x78   : > { %1233 = vmatprep.subr.bf16.mxu0 %v1232_v61 }
  0x7a   : > { %1285 = vmatpush3.bf16.msra.mxu1 (%p257_p4), %v1260_v48 }
  0x7b   : > { %1235 = vmatpush3.bf16.msra.mxu0 %v1232_v61  ;;  %1286 = vmatprep.subr.bf16.mxu1 (%p257_p4), %v1494_v44  ;;  %v595_v61 = vld [vmem:[#allocation8 + $0x60] sm:$0xff] (%p257_p4) }
  0x7c   : > { %1237 = vmatprep.subr.bf16.mxu0 %v1236_v1  ;;  %v1275_v63 = vpack.c.bf16 (%p257_p4), %v596_v62, %v595_v61 }
  0x7e   : > { %1288 = vmatpush3.bf16.msra.mxu1 (%p257_p4), %v1263_v51 }
  0x7f   : > { %1239 = vmatpush3.bf16.msra.mxu0 %v1236_v1  ;;  %1289 = vmatprep.subr.bf16.mxu1 (%p257_p4), %v1494_v44  ;;  %v598_v1 = vld [vmem:[#allocation8 + $0x78] sm:$0xff] (%p257_p4) }
  0x80   : > { %1241 = vmatprep.subr.bf16.mxu0 %v1240_v4  ;;  %v1278_v2 = vpack.c.bf16 (%p257_p4), %v598_v1, %v597_v0 }
  0x82   : > { %1291 = vmatpush3.bf16.msra.mxu1 (%p257_p4), %v1266_v54 }
  0x83   : > { %1243 = vmatpush3.bf16.msra.mxu0 %v1240_v4  ;;  %1292 = vmatprep.subr.bf16.mxu1 (%p257_p4), %v1494_v44 }
  0x84   : > { %1245 = vmatprep.subr.bf16.mxu0 %v1244_v7 }
  0x86   : > { %1294 = vmatpush3.bf16.msra.mxu1 (%p257_p4), %v1269_v57 }
  0x87   : > { %1247 = vmatpush3.bf16.msra.mxu0 %v1244_v7  ;;  %1295 = vmatprep.subr.bf16.mxu1 (%p257_p4), %v1494_v44 }
  0x88   : > { %1249 = vmatprep.subr.bf16.mxu0 %v1248_v10 }
  0x8a   : > { %1297 = vmatpush3.bf16.msra.mxu1 (%p257_p4), %v1272_v60 }
  0x8b   : > { %1251 = vmatpush3.bf16.msra.mxu0 %v1248_v10  ;;  %1298 = vmatprep.subr.bf16.mxu1 (%p257_p4), %v1494_v44 }
  0x8c   : > { %1253 = vmatprep.subr.bf16.mxu0 %v1252_v13 }
  0x8e   : > { %1300 = vmatpush3.bf16.msra.mxu1 (%p257_p4), %v1275_v63 }
  0x8f   : > { %1255 = vmatpush3.bf16.msra.mxu0 %v1252_v13  ;;  %1301 = vmatprep.subr.bf16.mxu1 (%p257_p4), %v1494_v44 }
  0x90   : > { %1256 = vmatprep.subr.bf16.mxu0 (%p257_p4), %v1494_v44 }
  0x92   : > { %1088 = vmatmul.mubr.f32.vlgmr.msra.gmra.mrb[0].mxu0 %v889_v14  ;;  %1303 = vmatpush3.bf16.msra.mxu1 (%p257_p4), %v1278_v2 }
  0x93   : > { %1122 = vmatprep.mubr.msk.f32.mxu0 (%p257_p4), %vm1495_vm0, %v1496_v47  ;;  %1258 = vmatpush3.bf16.msra.mxu0 (%p257_p4), %v1257_v45 }
  0x94   : > { %1259 = vmatprep.subr.bf16.mxu0 (%p257_p4), %v1494_v44 }
  0x97   : > { %1261 = vmatpush3.bf16.msra.mxu0 (%p257_p4), %v1260_v48 }
  0x98   : > { %1262 = vmatprep.subr.bf16.mxu0 (%p257_p4), %v1494_v44 }
  0x9b   : > { %1264 = vmatpush3.bf16.msra.mxu0 (%p257_p4), %v1263_v51 }
  0x9c   : > { %1265 = vmatprep.subr.bf16.mxu0 (%p257_p4), %v1494_v44 }
  0x9f   : > { %1267 = vmatpush3.bf16.msra.mxu0 (%p257_p4), %v1266_v54 }
  0xa0   : > { %1268 = vmatprep.subr.bf16.mxu0 (%p257_p4), %v1494_v44 }
  0xa3   : > { %1270 = vmatpush3.bf16.msra.mxu0 (%p257_p4), %v1269_v57 }
  0xa4   : > { %1271 = vmatprep.subr.bf16.mxu0 (%p257_p4), %v1494_v44 }
  0xa7   : > { %1273 = vmatpush3.bf16.msra.mxu0 (%p257_p4), %v1272_v60 }
  0xa8   : > { %1274 = vmatprep.subr.bf16.mxu0 (%p257_p4), %v1494_v44 }
  0xab   : > { %1276 = vmatpush3.bf16.msra.mxu0 (%p257_p4), %v1275_v63 }
  0xac   : > { %1277 = vmatprep.subr.bf16.mxu0 (%p257_p4), %v1494_v44 }
  0xaf   : > { %1279 = vmatpush3.bf16.msra.mxu0 (%p257_p4), %v1278_v2 }
 0x148   : > { %v1019_v15 = vpop.f32.mrb[0].mxu1 }
 0x149   : > { %v371_v16 = vpop.f32.mrb[1].mxu1 }
 0x165   : > { %v1089_v17 = vpop.f32.mrb[0].mxu0 }
 0x166   : > { %v1304_v18 = vadd.f32 %v1089_v17, %v1019_v15  ;;  %v542_v19 = vpop.f32.mrb[1].mxu0  ;;  %v757_v15 = vlaneseq (%p257_p4)  ;;  %v745_v17 = vld [vmem:[%s1692_s3] sm:$0x1] (%p257_p4) }
 0x167   : > { %v1305_v20 = vadd.f32 %v542_v19, %v371_v16 }
 0x168   : > { %557 = vst [vmem:[%s555_s13 + $0x8] sm:$0xff] %v1304_v18  ;;  %v570_v21 = vmul.f32 %v1304_v18, %v1304_v18  ;;  %v758_v16 = vshrl.u32 (%p257_p4), %v757_v15, 7 }
 0x169   : > { %556 = vst [vmem:[%s555_s13] sm:$0xff] %v1305_v20  ;;  %v559_v22 = vadd.f32 %v1305_v20, %v1304_v18  ;;  %v569_v23 = vmul.f32 %v1305_v20, %v1305_v20 }
 0x16a   : > { %v759_v18 = vsub.s32 (%p257_p4), 0, %v758_v16 }
 0x16b   : > { %v560_v24 = vrot.slane %v559_v22, 4  ;;  %v571_v25 = vadd.f32 %v570_v21, %v569_v23  ;;  %v749_v21 = vld [vmem:[%s1693_s4] sm:$0x1] (%p257_p4) }
 0x16d   : > { %v561_v26 = vadd.f32 %v560_v24, %v559_v22  ;;  %v572_v27 = vrot.slane %v571_v25, 4 }
 0x16f   : > { %v562_v28 = vrot.slane %v561_v26, 2  ;;  %v573_v29 = vadd.f32 %v572_v27, %v571_v25 }
 0x170   : > { %v752_v23 = vld [vmem:[#allocation2] sm:$0xff] (%p257_p4)  ;;  %v753_v25 = vld [vmem:[#allocation2 + $0x8] sm:$0xff] (%p257_p4)  ;;  %v755_v27 = vld [vmem:[#allocation2 + $0x18] sm:$0xff] (%p257_p4) }
 0x171   : > { %v563_v30 = vadd.f32 %v562_v28, %v561_v26  ;;  %v574_v31 = vrot.slane %v573_v29, 2  ;;  %v754_v26 = vld [vmem:[#allocation2 + $0x10] sm:$0xff] (%p257_p4) }
 0x173   : > { %v564_v32 = vrot.slane %v563_v30, 1  ;;  %v575_v33 = vadd.f32 %v574_v31, %v573_v29 }
 0x175   : > { %v565_v35 = vadd.f32 %v564_v32, %v563_v30  ;;  %v576_v36 = vrot.slane %v575_v33, 1  ;;  %581 = sbr.rel (!%p257_p4) target bundleno = 632 (0x278), region = 56 }
 0x177   : > { %v566_v38 = vadd.f32 %v565_v35, %v558_v34  ;;  %v577_v39 = vadd.f32 %v576_v36, %v575_v33 }
 0x179   : > { %567 = vst [vmem:[#allocation3] sm:$0x1] %v566_v38  ;;  %v578_v40 = vadd.f32 %v577_v39, %v568_v37 }
 0x17b   : > { %579 = vst [vmem:[#allocation4] sm:$0x1] %v578_v40 }
 0x180   : > { %v582_v3 = vld [vmem:[#allocation3] sm:$0x1] }
 0x181   : > { %1123 = vmatmul.mubr.f32.vlgmr.msra.gmra.mrb[0].mxu0 %v582_v3 }
 0x182   : > { %v669_v4 = vld [vmem:[#allocation4] sm:$0x1] }
 0x183   : > { %1158 = vmatmul.mubr.f32.vlgmr.msra.gmra.mrb[0].mxu1 %v669_v4 }
 0x254   : > { %v665_v5 = vpop.f32.mrb[0].mxu0 }
 0x255   : > { %v740_v7 = vmul.f32 0.001953125, %v665_v5  ;;  %v1124_v8 = vpop.f32.mrb[1].mxu0 }
 0x256   : > { %v736_v6 = vpop.f32.mrb[0].mxu1 }
 0x257   : > { %v741_v9 = vmul.f32 0.001953125, %v736_v6  ;;  %v1159_v10 = vpop.f32.mrb[1].mxu1  ;;  %v742_v11 = vmul.f32 %v740_v7, %v740_v7 }
 0x259   : > { %v743_v12 = vsub.f32 %v741_v9, %v742_v11 }
 0x25b   : > { %v744_v13 = vmax.f32 %v743_v12, 0.0 }
 0x25d   : > { %v746_v14 = vadd.f32 1e-05, %v744_v13 }
 0x25f   : > { %1369 = vrsqrt.f32 %v746_v14 }
 0x269   : > { %v1370_v19 = vpop.eup %1369 }
 0x26a   : > { %v748_v20 = vmul.f32 %v1370_v19, %v745_v17 }
 0x26c   : > { %v750_v22 = vmul.f32 %v748_v20, %v740_v7  ;;  %v760_v24 = vrot.slane %v748_v20, %v759_v18 }
 0x26e   : > { %v751_v28 = vsub.f32 %v749_v21, %v750_v22  ;;  %v762_v29 = vmul.f32 %v760_v24, %v752_v23  ;;  %v763_v30 = vmul.f32 %v760_v24, %v753_v25  ;;  %v764_v31 = vmul.f32 %v760_v24, %v754_v26 }
 0x26f   : > { %v765_v32 = vmul.f32 %v760_v24, %v755_v27 }
 0x270   : > { %v770_v33 = vrot.slane %v751_v28, %v759_v18 }
 0x272   : > { %v772_v34 = vadd.f32 %v770_v33, %v762_v29  ;;  %v773_v35 = vadd.f32 %v770_v33, %v763_v30  ;;  %v774_v36 = vadd.f32 %v770_v33, %v764_v31  ;;  %v775_v37 = vadd.f32 %v770_v33, %v765_v32 }
 0x274   : > { %v776_v38 = vmax.f32 %v772_v34, 0.0  ;;  %v777_v39 = vmax.f32 %v773_v35, 0.0  ;;  %v778_v40 = vmax.f32 %v774_v36, 0.0  ;;  %v779_v41 = vmax.f32 %v775_v37, 0.0 }
 0x276   : > { %780 = vst [vmem:[#allocation10] sm:$0xff] %v776_v38  ;;  %781 = vst [vmem:[#allocation10 + $0x8] sm:$0xff] %v777_v39 }
 0x277   : > { %782 = vst [vmem:[#allocation10 + $0x10] sm:$0xff] %v778_v40  ;;  %783 = vst [vmem:[#allocation10 + $0x18] sm:$0xff] %v779_v41 }
 0x278 PF: > { %p1654_p9 = scmp.eq.s32.totalorder %s875_s21, 1  ;;  %s1497_s25 = smov [#allocation10]  }
 0x279   : > { %s790_s28 = sshll.u32 %s1497_s25, 4  ;;  %s791_s28 = int_to_ptr.vmem [resolvable:$true] %s790_s28 }
 0x27a   : > { %s1427_s30 = scalar_lea.vmem %s791_s28, 512  ;;  %p1434_p13 = scmp.lt.s32.totalorder %s791_s28, %s791_s28 }
 0x27b   : > { %p1428_p10 = scmp.ne.s32.totalorder %s791_s28, %s1427_s30  ;;  %p1435_p0 = scmp.lt.s32.totalorder %s1427_s30, %s1427_s30 }
 0x27d   : > { %p1429_p11 = pnand %p1428_p10, %p1654_p9  ;;  %p1436_p1 = por %p1435_p0, %p1434_p13 }
 0x27f   : > { %p1430_p12 = pneg %p1429_p11 }
 0x281   : > { %p1437_p2 = pnand %p1436_p1, %p1430_p12 }
 0x283   : > { %1440 = shalt.err (!%p1437_p2)
}
 0x284   : > { %s1441_s21 = scalar_lea.hbm %s1694_s5, 512 }
 0x285   : > { %p1442_p5 = scmp.ne.s32.totalorder %s1694_s5, %s1441_s21  ;;  %p1447_p6 = scmp.lt.u32.totalorder %s1441_s21, %s1694_s5 }
 0x287   : > { %p1443_p7 = pnand %p1442_p5, %p1654_p9 }
 0x289   : > { %p1444_p3 = pneg %p1443_p7 }
 0x28b   : > { %p1449_p8 = pnand %p1447_p6, %p1444_p3 }
 0x28d   : > { %1452 = shalt.err (!%p1449_p8)
}
 0x28e   : > { %s1498_s23 = smov 128   ;;  %s1499_s27 = smov 8  }
 0x28f   : > { %1318 = dma.vmem_to_hbm [thread:$0]  (%p1654_p9), %s791_s28, 512, %s1694_s5, [#allocation7], %s1498_s23, %s1498_s23, %s1499_s27  }
 0x290   : > { %1474 = dma.done.wait (%p1654_p9), [#allocation7], 512  }
 0x291   : > { %1476 = vsyncadd (%p1654_p9), [#allocation7], 4294966784 }
 0x292 PF: > { %s18_s20 = sadd.s32 1, %s1487_s20   ;;  %s1704_s18 = smov %s1483_s19 }
 0x293   : > { %p15_p4 = scmp.ge.s32.totalorder %s18_s20, 4   ;;  %s1705_s19 = smov %s1707_s22 }
 0x295   :  { %17 = sbr.rel (!%p15_p4) target bundleno = 4 (0x4), region = 90 }
 0x29c   :  { %806 = vsyncpa [#allocation6], 1 }
 0x29d   :  { %808 = vsyncpa [#allocation6 + $0x1], 1 }
 0x29e   :  { %809 = vsyncpa [#allocation9], 1 }
 0x29f   :  { %810 = vsyncpa [#allocation7], 1 }
 0x2a0   :  { %812 = vsyncpa [#allocation7 + $0x1], 1 }

// kernel: tpu_custom_call.1
= control target key start
LH: loop header
LB: loop body
LE: loop exit
PB: predicated region body
PF: predicated region fallthrough
CT: control target
= control target key end

     0   :  { %10 = vsyncpa [#allocation6], 0  ;;  %s1689_s0 = inlined_call_operand.vmem [shape: f32[2,18,128], index: 0, kind: input, shape index: {}]   ;;  %s1690_s1 = inlined_call_operand.hbm [shape: f32[3,128,128], index: 1, kind: input, shape index: {}]   ;;  %s1691_s2 = inlined_call_operand.hbm [shape: f32[128,128], index: 2, kind: input, shape index: {}]   ;;  %s1692_s3 = inlined_call_operand.vmem [shape: f32[1,128], index: 3, kind: input, shape index: {}]   ;;  %s1693_s4 = inlined_call_operand.vmem [shape: f32[1,128], index: 4, kind: input, shape index: {}]   ;;  %s1694_s5 = inlined_call_operand.hbm [shape: f32[2,16,128], index: 5, kind: output, shape index: {}]  }
   0x1   :  { %11 = vsyncpa [#allocation9], 0 }
   0x2   :  { %12 = vsyncpa [#allocation7], 0  ;;  %s1530_s18 = smov 0   ;;  %s1532_s19 = smov 0  }
   0x3   :  { %s1534_s20 = smov 0  }
   0x4 LB: > { %s875_s21 = sadd.s32 4294967295, %s1487_s20   ;;  %s30_s22 = sadd.s32 1, %s1483_s19  ;;  %s1487_s20 = sphi %s1534_s20, %s18_s20   ;;  %s1483_s19 = sphi %s1532_s19, %s1705_s19   ;;  %s1479_s18 = sphi %s1530_s18, %s1704_s18  }
   0x5   : > { %p32_p0 = scmp.ge.s32.totalorder %s30_s22, 2  ;;  %p876_p1 = scmp.ge.s32.totalorder %s1487_s20, 1 }
   0x6   : > { %p166_p2 = scmp.lt.s32.totalorder %s1487_s20, 3  ;;  %p1557_p4 = scmp.eq.s32.totalorder %s875_s21, 0 }
   0x7   : > { %s1707_s22 = smov (%p32_p0, %s30_s22), 0  ;;  %s1489_s25 = smov [#allocation5]  }
   0x8   : > { %p1551_p3 = pnand %p876_p1, %p166_p2  ;;  %s178_s26 = sshll.u32 %s1489_s25, 4  ;;  %s179_s26 = int_to_ptr.vmem [resolvable:$true] %s178_s26 }
   0x9   : > { %s1699_s24 = scalar_select %p1557_p4, 1, 0 }
   0xa   : > { %s1698_s23 = scalar_select %p1551_p3, 1, 0 }
   0xb   : > { %p1321_p5 = pneg %p1551_p3  ;;  %s1490_s28 = smov [#allocation8]  }
   0xc   : > { %s191_s29 = sshll.u32 %s1490_s28, 4  ;;  %s1371_s7 = scalar_lea.hbm %s1690_s1, 6144  ;;  %s1569_s29 = int_to_ptr.vmem [resolvable:$true] %s191_s29 }
   0xd   : > { %p1565_p6 = pnand %p1557_p4, %p1321_p5  ;;  %p1372_p7 = scmp.ne.s32.totalorder %s1690_s1, %s1371_s7 }
   0xe   : > { %p1378_p11 = scmp.lt.u32.totalorder %s1371_s7, %s1690_s1 }
   0xf   : > { %p1373_p8 = pneg %p1565_p6 }
  0x11   : > { %p1374_p9 = pnand %p1373_p8, %p1372_p7 }
  0x13   : > { %p1375_p10 = pneg %p1374_p9 }
  0x15   : > { %p1380_p12 = pnand %p1378_p11, %p1375_p10 }
  0x17   : > { %1383 = shalt.err (!%p1380_p12)
}
  0x18   : > { %s1384_s12 = scalar_lea.vmem %s179_s26, 6144  ;;  %p1392_p2 = scmp.lt.s32.totalorder %s179_s26, %s179_s26 }
  0x19   : > { %p1385_p13 = scmp.ne.s32.totalorder %s179_s26, %s1384_s12  ;;  %p1393_p5 = scmp.lt.s32.totalorder %s1384_s12, %s1384_s12 }
  0x1b   : > { %p1387_p0 = pnand %p1385_p13, %p1373_p8  ;;  %p1394_p4 = por %p1393_p5, %p1392_p2 }
  0x1d   : > { %p1388_p1 = pneg %p1387_p0 }
  0x1f   : > { %p1395_p3 = pnand %p1394_p4, %p1388_p1 }
  0x21   : > { %1398 = shalt.err (!%p1395_p3)
}
  0x22   : > { %s1491_s13 = smov 128   ;;  %s1492_s14 = smov 8  }
  0x23   : > { %1324 = dma.hbm_to_vmem [thread:$0]  (!%p1565_p6), %s1690_s1, 6144, %s179_s26, [#allocation6], %s1491_s13, %s1491_s13, %s1492_s14  }
  0x24   : > { %s1399_s28 = scalar_lea.hbm %s1691_s2, 2048 }
  0x25   : > { %p1400_p7 = scmp.ne.s32.totalorder %s1691_s2, %s1399_s28  ;;  %p1406_p9 = scmp.lt.u32.totalorder %s1399_s28, %s1691_s2 }
  0x27   : > { %p1402_p3 = pnand %p1400_p7, %p1373_p8 }
  0x29   : > { %p1403_p4 = pneg %p1402_p3 }
  0x2b   : > { %p1408_p10 = pnand %p1406_p9, %p1403_p4 }
  0x2d   : > { %1411 = shalt.err (!%p1408_p10)
}
  0x2e   : > { %s1412_s26 = scalar_lea.vmem %s1569_s29, 2048  ;;  %p1420_p0 = scmp.lt.s32.totalorder %s1569_s29, %s1569_s29 }
  0x2f   : > { %p1413_p11 = scmp.ne.s32.totalorder %s1569_s29, %s1412_s26  ;;  %p1421_p1 = scmp.lt.s32.totalorder %s1412_s26, %s1412_s26 }
  0x31   : > { %p1415_p12 = pnand %p1413_p11, %p1373_p8  ;;  %p1422_p2 = por %p1421_p1, %p1420_p0 }
  0x33   : > { %p1416_p13 = pneg %p1415_p12 }
  0x35   : > { %p1423_p5 = pnand %p1422_p2, %p1416_p13 }
  0x37   : > { %1426 = shalt.err (!%p1423_p5)
}
  0x38   : > { %1327 = dma.hbm_to_vmem [thread:$0]  (!%p1565_p6), %s1691_s2, 2048, %s1569_s29, [#allocation9], %s1491_s13, %s1491_s13, %s1492_s14  }
  0x39   : > { %p1701_p7 = scmp.ne.s32.totalorder %s1698_s23, 0 }
  0x3a   : > { %p1702_p3 = scmp.ne.s32.totalorder (!%p1701_p7), %s1699_s24, 0 }
  0x3b   : > { %221 = sbr.rel (%p1701_p7) target bundleno = 658 (0x292), region = 40 }
  0x42   : > { %1466 = dma.done.wait (%p1702_p3), [#allocation6], 6144  }
  0x43   : > { %1468 = vsyncadd (%p1702_p3), [#allocation6], 4294961152 }
  0x44   : > { %1470 = dma.done.wait (%p1702_p3), [#allocation9], 2048  }
  0x45   : > { %1472 = vsyncadd (%p1702_p3), [#allocation9], 4294965248  ;;  %p248_p6 = scmp.lt.s32.totalorder %s1479_s18, 1  ;;  %p253_p8 = scmp.eq.s32.totalorder %s1479_s18, 0 }
  0x46   : > { %p257_p4 = scmp.eq.s32.totalorder %s1479_s18, 1  ;;  %v1493_v0 = vmov (%p253_p8), 0.0  }
  0x47   : > { %s249_s23 = scalar_select %p248_p6, %s1479_s18, 1 }
  0x48   : > { %261 = sbr.rel (!%p253_p8) target bundleno = 79 (0x4f), region = 52  ;;  %262 = vst [vmem:[#allocation3] sm:$0x1] (%p253_p8), %v1493_v0  ;;  %263 = vst [vmem:[#allocation4] sm:$0x1] (%p253_p8), %v1493_v0 }
  0x49   : > { %s1308_s27 = smul.u32 24, %s249_s23 }
  0x4b   : > { %s1635_s12 = scalar_lea.vmem %s1689_s0, %s1308_s27 }
  0x4f PF: > { %v268_v1 = vld [vmem:[#allocation5] sm:$0xff]  ;;  %v269_v2 = vld [vmem:[#allocation5 + $0x8] sm:$0xff]  ;;  %v270_v3 = vld [vmem:[#allocation5 + $0x10] sm:$0xff]  ;;  %s890_s24 = sshll.u32 %s1479_s18, 4  ;;  %vm1495_vm0 = vmmov (%p257_p4), 0  }
  0x50   : > { %v1192_v4 = vpack.c.bf16 %v269_v2, %v268_v1  ;;  %v271_v5 = vld [vmem:[#allocation5 + $0x18] sm:$0xff]  ;;  %v272_v7 = vld [vmem:[#allocation5 + $0x20] sm:$0xff]  ;;  %v273_v8 = vld [vmem:[#allocation5 + $0x28] sm:$0xff]  ;;  %s555_s13 = scalar_lea.vmem [#allocation2], %s890_s24 }
  0x51   : > { %v1196_v6 = vpack.c.bf16 %v271_v5, %v270_v3  ;;  %v1200_v9 = vpack.c.bf16 %v273_v8, %v272_v7  ;;  %v289_v10 = vld [vmem:[#allocation5 + $0x80] sm:$0xff]  ;;  %v290_v11 = vld [vmem:[#allocation5 + $0x88] sm:$0xff]  ;;  %v274_v12 = vld [vmem:[#allocation5 + $0x30] sm:$0xff] }
  0x52   : > { %1193 = vmatprep.subr.bf16.mxu0 %v1192_v4  ;;  %v275_v13 = vld [vmem:[#allocation5 + $0x38] sm:$0xff]  ;;  %v1160_v14 = vpack.c.bf16 %v290_v11, %v289_v10  ;;  %v291_v16 = vld [vmem:[#allocation5 + $0x90] sm:$0xff]  ;;  %v293_v19 = vld [vmem:[#allocation5 + $0xa0] sm:$0xff] }
  0x53   : > { %1195 = vmatpush3.bf16.msra.mxu0 %v1192_v4  ;;  %v266_v15 = vld [vmem:[%s1635_s12] sm:$0xff]  ;;  %v1204_v20 = vpack.c.bf16 %v275_v13, %v274_v12  ;;  %v294_v21 = vld [vmem:[#allocation5 + $0xa8] sm:$0xff]  ;;  %v295_v25 = vld [vmem:[#allocation5 + $0xb0] sm:$0xff] }
  0x54   : > { %1197 = vmatprep.subr.bf16.mxu0 %v1196_v6  ;;  %1052 = vmatprep.mubr.f32.mxu0 %v266_v15  ;;  %v292_v17 = vld [vmem:[#allocation5 + $0x98] sm:$0xff]  ;;  %v276_v22 = vld [vmem:[#allocation5 + $0x40] sm:$0xff]  ;;  %v277_v23 = vld [vmem:[#allocation5 + $0x48] sm:$0xff]  ;;  %v1168_v24 = vpack.c.bf16 %v294_v21, %v293_v19 }
  0x55   : > { %1161 = vmatprep.subr.bf16.mxu1 %v1160_v14  ;;  %v1164_v18 = vpack.c.bf16 %v292_v17, %v291_v16  ;;  %v296_v26 = vld [vmem:[#allocation5 + $0xb8] sm:$0xff]  ;;  %v1208_v27 = vpack.c.bf16 %v277_v23, %v276_v22  ;;  %v278_v28 = vld [vmem:[#allocation5 + $0x50] sm:$0xff]  ;;  %v297_v31 = vld [vmem:[#allocation5 + $0xc0] sm:$0xff] }
  0x56   : > { %1163 = vmatpush3.bf16.msra.mxu1 %v1160_v14  ;;  %v279_v29 = vld [vmem:[#allocation5 + $0x58] sm:$0xff]  ;;  %v1172_v30 = vpack.c.bf16 %v296_v26, %v295_v25  ;;  %v298_v32 = vld [vmem:[#allocation5 + $0xc8] sm:$0xff]  ;;  %v280_v35 = vld [vmem:[#allocation5 + $0x60] sm:$0xff] }
  0x57   : > { %1199 = vmatpush3.bf16.msra.mxu0 %v1196_v6  ;;  %1165 = vmatprep.subr.bf16.mxu1 %v1164_v18  ;;  %v886_v33 = vld [vmem:[%s1635_s12 + $0x1] sm:$0xff]  ;;  %v1212_v34 = vpack.c.bf16 %v279_v29, %v278_v28  ;;  %v281_v36 = vld [vmem:[#allocation5 + $0x68] sm:$0xff]  ;;  %v1176_v37 = vpack.c.bf16 %v298_v32, %v297_v31  ;;  %v299_v38 = vld [vmem:[#allocation5 + $0xd0] sm:$0xff] }
  0x58   : > { %1201 = vmatprep.subr.bf16.mxu0 %v1200_v9  ;;  %1017 = vmatprep.mubr.f32.mxu1 %v886_v33  ;;  %v300_v39 = vld [vmem:[#allocation5 + $0xd8] sm:$0xff]  ;;  %v1216_v40 = vpack.c.bf16 %v281_v36, %v280_v35  ;;  %v282_v41 = vld [vmem:[#allocation5 + $0x70] sm:$0xff]  ;;  %v301_v44 = vld [vmem:[#allocation5 + $0xe0] sm:$0xff] }
  0x59   : > { %v283_v42 = vld [vmem:[#allocation5 + $0x78] sm:$0xff]  ;;  %v1180_v43 = vpack.c.bf16 %v300_v39, %v299_v38  ;;  %v302_v45 = vld [vmem:[#allocation5 + $0xe8] sm:$0xff]  ;;  %v460_v47 = vld [vmem:[#allocation5 + $0x100] sm:$0xff] }
  0x5a   : > { %1167 = vmatpush3.bf16.msra.mxu1 %v1164_v18  ;;  %v1220_v46 = vpack.c.bf16 %v283_v42, %v282_v41  ;;  %v461_v48 = vld [vmem:[#allocation5 + $0x108] sm:$0xff]  ;;  %v1184_v49 = vpack.c.bf16 %v302_v45, %v301_v44  ;;  %v303_v50 = vld [vmem:[#allocation5 + $0xf0] sm:$0xff]  ;;  %v304_v51 = vld [vmem:[#allocation5 + $0xf8] sm:$0xff]  ;;  %v1494_v44 = vmov (%p257_p4), 0.0|0.0  }
  0x5b   : > { %1203 = vmatpush3.bf16.msra.mxu0 %v1200_v9  ;;  %1169 = vmatprep.subr.bf16.mxu1 %v1168_v24  ;;  %v1224_v52 = vpack.c.bf16 %v461_v48, %v460_v47  ;;  %v462_v53 = vld [vmem:[#allocation5 + $0x110] sm:$0xff]  ;;  %v463_v54 = vld [vmem:[#allocation5 + $0x118] sm:$0xff]  ;;  %v1188_v55 = vpack.c.bf16 %v304_v51, %v303_v50  ;;  %v267_v56 = vld [vmem:[%s1635_s12 + $0x8] sm:$0xff]  ;;  %v1496_v47 = vmov (%p257_p4), 0.0  }
  0x5c   : > { %1205 = vmatprep.subr.bf16.mxu0 %v1204_v20  ;;  %v1228_v57 = vpack.c.bf16 %v463_v54, %v462_v53  ;;  %v888_v58 = vld [vmem:[%s1635_s12 + $0x2] sm:$0xff]  ;;  %v465_v60 = vld [vmem:[#allocation5 + $0x128] sm:$0xff]  ;;  %v466_v63 = vld [vmem:[#allocation5 + $0x130] sm:$0xff] }
  0x5d   : > { %v464_v59 = vld [vmem:[#allocation5 + $0x120] sm:$0xff]  ;;  %v467_v0 = vld [vmem:[#allocation5 + $0x138] sm:$0xff]  ;;  %v469_v3 = vld [vmem:[#allocation5 + $0x148] sm:$0xff] }
  0x5e   : > { %1171 = vmatpush3.bf16.msra.mxu1 %v1168_v24  ;;  %v1232_v61 = vpack.c.bf16 %v465_v60, %v464_v59  ;;  %v887_v62 = vld [vmem:[%s1635_s12 + $0x9] sm:$0xff]  ;;  %v1236_v1 = vpack.c.bf16 %v467_v0, %v466_v63  ;;  %v470_v5 = vld [vmem:[#allocation5 + $0x150] sm:$0xff]  ;;  %v471_v6 = vld [vmem:[#allocation5 + $0x158] sm:$0xff] }
  0x5f   : > { %1207 = vmatpush3.bf16.msra.mxu0 %v1204_v20  ;;  %1173 = vmatprep.subr.bf16.mxu1 %v1172_v30  ;;  %v468_v2 = vld [vmem:[#allocation5 + $0x140] sm:$0xff]  ;;  %v1244_v7 = vpack.c.bf16 %v471_v6, %v470_v5  ;;  %v473_v9 = vld [vmem:[#allocation5 + $0x168] sm:$0xff]  ;;  %v474_v11 = vld [vmem:[#allocation5 + $0x170] sm:$0xff] }
  0x60   : > { %1209 = vmatprep.subr.bf16.mxu0 %v1208_v27  ;;  %v1240_v4 = vpack.c.bf16 %v469_v3, %v468_v2  ;;  %v472_v8 = vld [vmem:[#allocation5 + $0x160] sm:$0xff]  ;;  %v475_v12 = vld [vmem:[#allocation5 + $0x178] sm:$0xff]  ;;  %v889_v14 = vld [vmem:[%s1635_s12 + $0xa] sm:$0xff] }
  0x61   : > { %v1248_v10 = vpack.c.bf16 %v473_v9, %v472_v8  ;;  %v1252_v13 = vpack.c.bf16 %v475_v12, %v474_v11  ;;  %v583_v41 = vld [vmem:[#allocation8] sm:$0xff] (%p257_p4)  ;;  %v584_v42 = vld [vmem:[#allocation8 + $0x8] sm:$0xff] (%p257_p4)  ;;  %v590_v53 = vld [vmem:[#allocation8 + $0x38] sm:$0xff] (%p257_p4) }
  0x62   : > { %1175 = vmatpush3.bf16.msra.mxu1 %v1172_v30  ;;  %v1257_v45 = vpack.c.bf16 (%p257_p4), %v584_v42, %v583_v41  ;;  %v588_v50 = vld [vmem:[#allocation8 + $0x28] sm:$0xff] (%p257_p4)  ;;  %v594_v59 = vld [vmem:[#allocation8 + $0x58] sm:$0xff] (%p257_p4)  ;;  %v597_v0 = vld [vmem:[#allocation8 + $0x70] sm:$0xff] (%p257_p4) }
  0x63   : > { %1211 = vmatpush3.bf16.msra.mxu0 %v1208_v27  ;;  %1177 = vmatprep.subr.bf16.mxu1 %v1176_v37 }
  0x64   : > { %1213 = vmatprep.subr.bf16.mxu0 %v1212_v34 }
  0x66   : > { %1179 = vmatpush3.bf16.msra.mxu1 %v1176_v37  ;;  %v568_v37 = vld [vmem:[#allocation4] sm:$0x1] }
  0x67   : > { %1215 = vmatpush3.bf16.msra.mxu0 %v1212_v34  ;;  %1181 = vmatprep.subr.bf16.mxu1 %v1180_v43  ;;  %v558_v34 = vld [vmem:[#allocation3] sm:$0x1] }
  0x68   : > { %1217 = vmatprep.subr.bf16.mxu0 %v1216_v40 }
  0x6a   : > { %1183 = vmatpush3.bf16.msra.mxu1 %v1180_v43  ;;  %v585_v43 = vld [vmem:[#allocation8 + $0x10] sm:$0xff] (%p257_p4) }
  0x6b   : > { %1219 = vmatpush3.bf16.msra.mxu0 %v1216_v40  ;;  %1185 = vmatprep.subr.bf16.mxu1 %v1184_v49 }
  0x6c   : > { %1221 = vmatprep.subr.bf16.mxu0 %v1220_v46 }
  0x6e   : > { %1187 = vmatpush3.bf16.msra.mxu1 %v1184_v49  ;;  %v587_v49 = vld [vmem:[#allocation8 + $0x20] sm:$0xff] (%p257_p4) }
  0x6f   : > { %1223 = vmatpush3.bf16.msra.mxu0 %v1220_v46  ;;  %1189 = vmatprep.subr.bf16.mxu1 %v1188_v55  ;;  %v586_v46 = vld [vmem:[#allocation8 + $0x18] sm:$0xff] (%p257_p4)  ;;  %v1263_v51 = vpack.c.bf16 (%p257_p4), %v588_v50, %v587_v49 }
  0x70   : > { %1225 = vmatprep.subr.bf16.mxu0 %v1224_v52  ;;  %v1260_v48 = vpack.c.bf16 (%p257_p4), %v586_v46, %v585_v43 }
  0x72   : > { %1053 = vmatmul.mubr.f32.vlgmr.msra.gmra.mrb[0].mxu0 %v267_v56  ;;  %1191 = vmatpush3.bf16.msra.mxu1 %v1188_v55  ;;  %v591_v55 = vld [vmem:[#allocation8 + $0x40] sm:$0xff] (%p257_p4)  ;;  %v592_v56 = vld [vmem:[#allocation8 + $0x48] sm:$0xff] (%p257_p4) }
  0x73   : > { %1227 = vmatpush3.bf16.msra.mxu0 %v1224_v52  ;;  %1087 = vmatprep.mubr.f32.mxu0 %v888_v58  ;;  %v589_v52 = vld [vmem:[#allocation8 + $0x30] sm:$0xff] (%p257_p4) }
  0x74   : > { %1229 = vmatprep.subr.bf16.mxu0 %v1228_v57  ;;  %1280 = vmatprep.subr.bf16.mxu1 (%p257_p4), %v1494_v44  ;;  %v1266_v54 = vpack.c.bf16 (%p257_p4), %v590_v53, %v589_v52  ;;  %v593_v58 = vld [vmem:[#allocation8 + $0x50] sm:$0xff] (%p257_p4) }
  0x75   : > { %1018 = vmatmul.mubr.f32.vlgmr.msra.gmra.mrb[0].mxu1 %v887_v62  ;;  %v1272_v60 = vpack.c.bf16 (%p257_p4), %v594_v59, %v593_v58  ;;  %v596_v62 = vld [vmem:[#allocation8 + $0x68] sm:$0xff] (%p257_p4) }
  0x76   : > { %1157 = vmatprep.mubr.msk.f32.mxu1 (%p257_p4), %vm1495_vm0, %v1496_v47  ;;  %1282 = vmatpush3.bf16.msra.mxu1 (%p257_p4), %v1257_v45 }
  0x77   : > { %1231 = vmatpush3.bf16.msra.mxu0 %v1228_v57  ;;  %1283 = vmatprep.subr.bf16.mxu1 (%p257_p4), %v1494_v44  ;;  %v1269_v57 = vpack.c.bf16 (%p257_p4), %v592_v56, %v591_v55 }
  0x78   : > { %1233 = vmatprep.subr.bf16.mxu0 %v1232_v61 }
  0x7a   : > { %1285 = vmatpush3.bf16.msra.mxu1 (%p257_p4), %v1260_v48 }
  0x7b   : > { %1235 = vmatpush3.bf16.msra.mxu0 %v1232_v61  ;;  %1286 = vmatprep.subr.bf16.mxu1 (%p257_p4), %v1494_v44  ;;  %v595_v61 = vld [vmem:[#allocation8 + $0x60] sm:$0xff] (%p257_p4) }
  0x7c   : > { %1237 = vmatprep.subr.bf16.mxu0 %v1236_v1  ;;  %v1275_v63 = vpack.c.bf16 (%p257_p4), %v596_v62, %v595_v61 }
  0x7e   : > { %1288 = vmatpush3.bf16.msra.mxu1 (%p257_p4), %v1263_v51 }
  0x7f   : > { %1239 = vmatpush3.bf16.msra.mxu0 %v1236_v1  ;;  %1289 = vmatprep.subr.bf16.mxu1 (%p257_p4), %v1494_v44  ;;  %v598_v1 = vld [vmem:[#allocation8 + $0x78] sm:$0xff] (%p257_p4) }
  0x80   : > { %1241 = vmatprep.subr.bf16.mxu0 %v1240_v4  ;;  %v1278_v2 = vpack.c.bf16 (%p257_p4), %v598_v1, %v597_v0 }
  0x82   : > { %1291 = vmatpush3.bf16.msra.mxu1 (%p257_p4), %v1266_v54 }
  0x83   : > { %1243 = vmatpush3.bf16.msra.mxu0 %v1240_v4  ;;  %1292 = vmatprep.subr.bf16.mxu1 (%p257_p4), %v1494_v44 }
  0x84   : > { %1245 = vmatprep.subr.bf16.mxu0 %v1244_v7 }
  0x86   : > { %1294 = vmatpush3.bf16.msra.mxu1 (%p257_p4), %v1269_v57 }
  0x87   : > { %1247 = vmatpush3.bf16.msra.mxu0 %v1244_v7  ;;  %1295 = vmatprep.subr.bf16.mxu1 (%p257_p4), %v1494_v44 }
  0x88   : > { %1249 = vmatprep.subr.bf16.mxu0 %v1248_v10 }
  0x8a   : > { %1297 = vmatpush3.bf16.msra.mxu1 (%p257_p4), %v1272_v60 }
  0x8b   : > { %1251 = vmatpush3.bf16.msra.mxu0 %v1248_v10  ;;  %1298 = vmatprep.subr.bf16.mxu1 (%p257_p4), %v1494_v44 }
  0x8c   : > { %1253 = vmatprep.subr.bf16.mxu0 %v1252_v13 }
  0x8e   : > { %1300 = vmatpush3.bf16.msra.mxu1 (%p257_p4), %v1275_v63 }
  0x8f   : > { %1255 = vmatpush3.bf16.msra.mxu0 %v1252_v13  ;;  %1301 = vmatprep.subr.bf16.mxu1 (%p257_p4), %v1494_v44 }
  0x90   : > { %1256 = vmatprep.subr.bf16.mxu0 (%p257_p4), %v1494_v44 }
  0x92   : > { %1088 = vmatmul.mubr.f32.vlgmr.msra.gmra.mrb[0].mxu0 %v889_v14  ;;  %1303 = vmatpush3.bf16.msra.mxu1 (%p257_p4), %v1278_v2 }
  0x93   : > { %1122 = vmatprep.mubr.msk.f32.mxu0 (%p257_p4), %vm1495_vm0, %v1496_v47  ;;  %1258 = vmatpush3.bf16.msra.mxu0 (%p257_p4), %v1257_v45 }
  0x94   : > { %1259 = vmatprep.subr.bf16.mxu0 (%p257_p4), %v1494_v44 }
  0x97   : > { %1261 = vmatpush3.bf16.msra.mxu0 (%p257_p4), %v1260_v48 }
  0x98   : > { %1262 = vmatprep.subr.bf16.mxu0 (%p257_p4), %v1494_v44 }
  0x9b   : > { %1264 = vmatpush3.bf16.msra.mxu0 (%p257_p4), %v1263_v51 }
  0x9c   : > { %1265 = vmatprep.subr.bf16.mxu0 (%p257_p4), %v1494_v44 }
  0x9f   : > { %1267 = vmatpush3.bf16.msra.mxu0 (%p257_p4), %v1266_v54 }
  0xa0   : > { %1268 = vmatprep.subr.bf16.mxu0 (%p257_p4), %v1494_v44 }
  0xa3   : > { %1270 = vmatpush3.bf16.msra.mxu0 (%p257_p4), %v1269_v57 }
  0xa4   : > { %1271 = vmatprep.subr.bf16.mxu0 (%p257_p4), %v1494_v44 }
  0xa7   : > { %1273 = vmatpush3.bf16.msra.mxu0 (%p257_p4), %v1272_v60 }
  0xa8   : > { %1274 = vmatprep.subr.bf16.mxu0 (%p257_p4), %v1494_v44 }
  0xab   : > { %1276 = vmatpush3.bf16.msra.mxu0 (%p257_p4), %v1275_v63 }
  0xac   : > { %1277 = vmatprep.subr.bf16.mxu0 (%p257_p4), %v1494_v44 }
  0xaf   : > { %1279 = vmatpush3.bf16.msra.mxu0 (%p257_p4), %v1278_v2 }
 0x148   : > { %v1019_v15 = vpop.f32.mrb[0].mxu1 }
 0x149   : > { %v371_v16 = vpop.f32.mrb[1].mxu1 }
 0x165   : > { %v1089_v17 = vpop.f32.mrb[0].mxu0 }
 0x166   : > { %v1304_v18 = vadd.f32 %v1089_v17, %v1019_v15  ;;  %v542_v19 = vpop.f32.mrb[1].mxu0  ;;  %v757_v15 = vlaneseq (%p257_p4)  ;;  %v745_v17 = vld [vmem:[%s1692_s3] sm:$0x1] (%p257_p4) }
 0x167   : > { %v1305_v20 = vadd.f32 %v542_v19, %v371_v16 }
 0x168   : > { %557 = vst [vmem:[%s555_s13 + $0x8] sm:$0xff] %v1304_v18  ;;  %v570_v21 = vmul.f32 %v1304_v18, %v1304_v18  ;;  %v758_v16 = vshrl.u32 (%p257_p4), %v757_v15, 7 }
 0x169   : > { %556 = vst [vmem:[%s555_s13] sm:$0xff] %v1305_v20  ;;  %v559_v22 = vadd.f32 %v1305_v20, %v1304_v18  ;;  %v569_v23 = vmul.f32 %v1305_v20, %v1305_v20 }
 0x16a   : > { %v759_v18 = vsub.s32 (%p257_p4), 0, %v758_v16 }
 0x16b   : > { %v560_v24 = vrot.slane %v559_v22, 4  ;;  %v571_v25 = vadd.f32 %v570_v21, %v569_v23  ;;  %v749_v21 = vld [vmem:[%s1693_s4] sm:$0x1] (%p257_p4) }
 0x16d   : > { %v561_v26 = vadd.f32 %v560_v24, %v559_v22  ;;  %v572_v27 = vrot.slane %v571_v25, 4 }
 0x16f   : > { %v562_v28 = vrot.slane %v561_v26, 2  ;;  %v573_v29 = vadd.f32 %v572_v27, %v571_v25 }
 0x170   : > { %v752_v23 = vld [vmem:[#allocation2] sm:$0xff] (%p257_p4)  ;;  %v753_v25 = vld [vmem:[#allocation2 + $0x8] sm:$0xff] (%p257_p4)  ;;  %v755_v27 = vld [vmem:[#allocation2 + $0x18] sm:$0xff] (%p257_p4) }
 0x171   : > { %v563_v30 = vadd.f32 %v562_v28, %v561_v26  ;;  %v574_v31 = vrot.slane %v573_v29, 2  ;;  %v754_v26 = vld [vmem:[#allocation2 + $0x10] sm:$0xff] (%p257_p4) }
 0x173   : > { %v564_v32 = vrot.slane %v563_v30, 1  ;;  %v575_v33 = vadd.f32 %v574_v31, %v573_v29 }
 0x175   : > { %v565_v35 = vadd.f32 %v564_v32, %v563_v30  ;;  %v576_v36 = vrot.slane %v575_v33, 1  ;;  %581 = sbr.rel (!%p257_p4) target bundleno = 632 (0x278), region = 56 }
 0x177   : > { %v566_v38 = vadd.f32 %v565_v35, %v558_v34  ;;  %v577_v39 = vadd.f32 %v576_v36, %v575_v33 }
 0x179   : > { %567 = vst [vmem:[#allocation3] sm:$0x1] %v566_v38  ;;  %v578_v40 = vadd.f32 %v577_v39, %v568_v37 }
 0x17b   : > { %579 = vst [vmem:[#allocation4] sm:$0x1] %v578_v40 }
 0x180   : > { %v582_v3 = vld [vmem:[#allocation3] sm:$0x1] }
 0x181   : > { %1123 = vmatmul.mubr.f32.vlgmr.msra.gmra.mrb[0].mxu0 %v582_v3 }
 0x182   : > { %v669_v4 = vld [vmem:[#allocation4] sm:$0x1] }
 0x183   : > { %1158 = vmatmul.mubr.f32.vlgmr.msra.gmra.mrb[0].mxu1 %v669_v4 }
 0x254   : > { %v665_v5 = vpop.f32.mrb[0].mxu0 }
 0x255   : > { %v740_v7 = vmul.f32 0.001953125, %v665_v5  ;;  %v1124_v8 = vpop.f32.mrb[1].mxu0 }
 0x256   : > { %v736_v6 = vpop.f32.mrb[0].mxu1 }
 0x257   : > { %v741_v9 = vmul.f32 0.001953125, %v736_v6  ;;  %v1159_v10 = vpop.f32.mrb[1].mxu1  ;;  %v742_v11 = vmul.f32 %v740_v7, %v740_v7 }
 0x259   : > { %v743_v12 = vsub.f32 %v741_v9, %v742_v11 }
 0x25b   : > { %v744_v13 = vmax.f32 %v743_v12, 0.0 }
 0x25d   : > { %v746_v14 = vadd.f32 1e-05, %v744_v13 }
 0x25f   : > { %1369 = vrsqrt.f32 %v746_v14 }
 0x269   : > { %v1370_v19 = vpop.eup %1369 }
 0x26a   : > { %v748_v20 = vmul.f32 %v1370_v19, %v745_v17 }
 0x26c   : > { %v750_v22 = vmul.f32 %v748_v20, %v740_v7  ;;  %v760_v24 = vrot.slane %v748_v20, %v759_v18 }
 0x26e   : > { %v751_v28 = vsub.f32 %v749_v21, %v750_v22  ;;  %v762_v29 = vmul.f32 %v760_v24, %v752_v23  ;;  %v763_v30 = vmul.f32 %v760_v24, %v753_v25  ;;  %v764_v31 = vmul.f32 %v760_v24, %v754_v26 }
 0x26f   : > { %v765_v32 = vmul.f32 %v760_v24, %v755_v27 }
 0x270   : > { %v770_v33 = vrot.slane %v751_v28, %v759_v18 }
 0x272   : > { %v772_v34 = vadd.f32 %v770_v33, %v762_v29  ;;  %v773_v35 = vadd.f32 %v770_v33, %v763_v30  ;;  %v774_v36 = vadd.f32 %v770_v33, %v764_v31  ;;  %v775_v37 = vadd.f32 %v770_v33, %v765_v32 }
 0x274   : > { %v776_v38 = vmax.f32 %v772_v34, 0.0  ;;  %v777_v39 = vmax.f32 %v773_v35, 0.0  ;;  %v778_v40 = vmax.f32 %v774_v36, 0.0  ;;  %v779_v41 = vmax.f32 %v775_v37, 0.0 }
 0x276   : > { %780 = vst [vmem:[#allocation10] sm:$0xff] %v776_v38  ;;  %781 = vst [vmem:[#allocation10 + $0x8] sm:$0xff] %v777_v39 }
 0x277   : > { %782 = vst [vmem:[#allocation10 + $0x10] sm:$0xff] %v778_v40  ;;  %783 = vst [vmem:[#allocation10 + $0x18] sm:$0xff] %v779_v41 }
 0x278 PF: > { %p1654_p9 = scmp.eq.s32.totalorder %s875_s21, 1  ;;  %s1497_s25 = smov [#allocation10]  }
 0x279   : > { %s790_s28 = sshll.u32 %s1497_s25, 4  ;;  %s791_s28 = int_to_ptr.vmem [resolvable:$true] %s790_s28 }
 0x27a   : > { %s1427_s30 = scalar_lea.vmem %s791_s28, 512  ;;  %p1434_p13 = scmp.lt.s32.totalorder %s791_s28, %s791_s28 }
 0x27b   : > { %p1428_p10 = scmp.ne.s32.totalorder %s791_s28, %s1427_s30  ;;  %p1435_p0 = scmp.lt.s32.totalorder %s1427_s30, %s1427_s30 }
 0x27d   : > { %p1429_p11 = pnand %p1428_p10, %p1654_p9  ;;  %p1436_p1 = por %p1435_p0, %p1434_p13 }
 0x27f   : > { %p1430_p12 = pneg %p1429_p11 }
 0x281   : > { %p1437_p2 = pnand %p1436_p1, %p1430_p12 }
 0x283   : > { %1440 = shalt.err (!%p1437_p2)
}
 0x284   : > { %s1441_s21 = scalar_lea.hbm %s1694_s5, 512 }
 0x285   : > { %p1442_p5 = scmp.ne.s32.totalorder %s1694_s5, %s1441_s21  ;;  %p1447_p6 = scmp.lt.u32.totalorder %s1441_s21, %s1694_s5 }
 0x287   : > { %p1443_p7 = pnand %p1442_p5, %p1654_p9 }
 0x289   : > { %p1444_p3 = pneg %p1443_p7 }
 0x28b   : > { %p1449_p8 = pnand %p1447_p6, %p1444_p3 }
 0x28d   : > { %1452 = shalt.err (!%p1449_p8)
}
 0x28e   : > { %s1498_s23 = smov 128   ;;  %s1499_s27 = smov 8  }
 0x28f   : > { %1318 = dma.vmem_to_hbm [thread:$0]  (%p1654_p9), %s791_s28, 512, %s1694_s5, [#allocation7], %s1498_s23, %s1498_s23, %s1499_s27  }
 0x290   : > { %1474 = dma.done.wait (%p1654_p9), [#allocation7], 512  }
 0x291   : > { %1476 = vsyncadd (%p1654_p9), [#allocation7], 4294966784 }
 0x292 PF: > { %s18_s20 = sadd.s32 1, %s1487_s20   ;;  %s1704_s18 = smov %s1483_s19 }
 0x293   : > { %p15_p4 = scmp.ge.s32.totalorder %s18_s20, 4   ;;  %s1705_s19 = smov %s1707_s22 }
 0x295   :  { %17 = sbr.rel (!%p15_p4) target bundleno = 4 (0x4), region = 90 }
 0x29c   :  { %806 = vsyncpa [#allocation6], 1 }
 0x29d   :  { %808 = vsyncpa [#allocation6 + $0x1], 1 }
 0x29e   :  { %809 = vsyncpa [#allocation9], 1 }
 0x29f   :  { %810 = vsyncpa [#allocation7], 1 }
 0x2a0   :  { %812 = vsyncpa [#allocation7 + $0x1], 1 }

</bundles_post_ra>
